<compile_context>
chip_gen: v7x
topology: tpu7x:2x2x1
jax: 0.10.0
libtpu: 0.0.40
codegen_flags: <defaults>
</compile_context>

<pallas_src>
import jax
import jax.numpy as jnp
import numpy as np
from jax.experimental import pallas as pl
from jax.experimental.pallas import tpu as pltpu

OUT_LANES = 128


def decoder_kernel(x_ref,
                   w1_ih_ref, w1_hh_ref, b1_ref,
                   w2_ih_ref, w2_hh_ref, b2_ref,
                   wl_ref, bl_ref,
                   y_ref,
                   hf_s, hb_s, x2_s, h2_s):
    D = x_ref.shape[1]          # rnn1 hidden size per direction == input_dim
    S = hf_s.shape[0]           # seq_len (static)
    H2 = 2 * D                  # rnn2 hidden size

    # ---- rnn1: fused bidirectional LSTM -------------------------------------
    # Input is the same latent at every timestep -> project once: (1, 8D).
    pre1 = (jnp.dot(x_ref[...], w1_ih_ref[...],
                    preferred_element_type=jnp.float32) + b1_ref[...])

    h1 = jnp.zeros((1, 2 * D), jnp.float32)   # [h_fwd | h_bwd]
    c1 = jnp.zeros((1, 2 * D), jnp.float32)
    for t in range(S):                        # fully unrolled, static indices
        gates = pre1 + jnp.dot(h1, w1_hh_ref[...],
                               preferred_element_type=jnp.float32)  # (1, 8D)
        i = jax.nn.sigmoid(gates[:, 0 * D:2 * D])
        f = jax.nn.sigmoid(gates[:, 2 * D:4 * D])
        g = jnp.tanh(gates[:, 4 * D:6 * D])
        o = jax.nn.sigmoid(gates[:, 6 * D:8 * D])
        c1 = f * c1 + i * g
        h1 = o * jnp.tanh(c1)
        hf_s[t:t + 1, :] = h1[:, 0:D]               # forward output at time t
        hb_s[S - 1 - t:S - t, :] = h1[:, D:2 * D]   # backward output at time S-1-t

    # ---- rnn2 input projection (whole sequence, one pass on the MXU) --------
    # concat([hf, hb], axis=1) @ W2_ih expressed as two row-slice matmuls
    # (avoids an in-kernel lane concat).
    x2_s[...] = (jnp.dot(hf_s[...], w2_ih_ref[0:D, :],
                         preferred_element_type=jnp.float32)
                 + jnp.dot(hb_s[...], w2_ih_ref[D:2 * D, :],
                           preferred_element_type=jnp.float32)
                 + b2_ref[...])

    # ---- rnn2: unidirectional LSTM -------------------------------------------
    h2 = jnp.zeros((1, H2), jnp.float32)
    c2 = jnp.zeros((1, H2), jnp.float32)
    for t in range(S):
        gates = x2_s[t:t + 1, :] + jnp.dot(h2, w2_hh_ref[...],
                                           preferred_element_type=jnp.float32)
        i = jax.nn.sigmoid(gates[:, 0 * H2:1 * H2])
        f = jax.nn.sigmoid(gates[:, 1 * H2:2 * H2])
        g = jnp.tanh(gates[:, 2 * H2:3 * H2])
        o = jax.nn.sigmoid(gates[:, 3 * H2:4 * H2])
        c2 = f * c2 + i * g
        h2 = o * jnp.tanh(c2)
        h2_s[t:t + 1, :] = h2

    # ---- output linear (wl zero-padded to 128 lanes -> lane-dense store) -----
    y_ref[...] = (jnp.dot(h2_s[...], wl_ref[...],
                          preferred_element_type=jnp.float32) + bl_ref[...])


def _fuse_rnn1(params, D):
    """Build interleaved-gate input weights/bias and the block-diagonal
    hidden->gate weight for the fused bidirectional rnn1 chain.
    Column layout: [i_f, i_b, f_f, f_b, g_f, g_b, o_f, o_b] (each D wide)."""
    wf_ih, wb_ih = params["w1f_ih"], params["w1b_ih"]   # (D, 4D)
    wf_hh, wb_hh = params["w1f_hh"], params["w1b_hh"]   # (D, 4D)
    bf, bb = params["b1f"], params["b1b"]               # (1, 4D)

    zero = jnp.zeros((D, D), jnp.float32)
    ih_cols, b_cols, hh_cols = [], [], []
    for k in range(4):                                   # torch gate order i, f, g, o
        sl = slice(k * D, (k + 1) * D)
        ih_cols += [wf_ih[:, sl], wb_ih[:, sl]]
        b_cols += [bf[:, sl], bb[:, sl]]
        hh_cols += [jnp.concatenate([wf_hh[:, sl], zero], axis=0),
                    jnp.concatenate([zero, wb_hh[:, sl]], axis=0)]
    w1_ih = jnp.concatenate(ih_cols, axis=1)             # (D,  8D)
    b1 = jnp.concatenate(b_cols, axis=1)                 # (1,  8D)
    w1_hh = jnp.concatenate(hh_cols, axis=1)             # (2D, 8D)
    return w1_ih, w1_hh, b1


def decoder_forward(x, params, seq_len, input_dim, n_features=1):
    # torch: x.repeat(seq_len, n_features).reshape((n_features, seq_len, D));
    # the module's final reshape((seq_len, hidden_dim)) requires n_features == 1,
    # in which case every timestep's input is exactly the latent row x.
    assert n_features == 1, "Decoder (torch module) only supports n_features == 1"
    assert x.shape == (1, input_dim)

    S, D = seq_len, input_dim
    H2 = 2 * D

    w1_ih, w1_hh, b1 = _fuse_rnn1(params, D)
    wl_pad = jnp.zeros((H2, OUT_LANES), jnp.float32).at[:, :n_features].set(params["wl"])
    bl_pad = jnp.zeros((1, OUT_LANES), jnp.float32).at[:, :n_features].set(params["bl"])

    vmem = pl.BlockSpec(memory_space=pltpu.MemorySpace.VMEM)
    # TODO(synk): for batched latents, add a leading grid axis with
    # dimension_semantics=("parallel",) (uses both TCs on v7x) and stack the batch
    # on the sublane axis of every recurrent matmul.
    y_pad = pl.pallas_call(
        decoder_kernel,
        out_shape=jax.ShapeDtypeStruct((S, OUT_LANES), jnp.float32),
        in_specs=[vmem] * 9,
        out_specs=vmem,
        scratch_shapes=[
            pltpu.VMEM((S, D), jnp.float32),       # hf_s
            pltpu.VMEM((S, D), jnp.float32),       # hb_s
            pltpu.VMEM((S, 4 * H2), jnp.float32),  # x2_s
            pltpu.VMEM((S, H2), jnp.float32),      # h2_s
        ],
    )(x, w1_ih, w1_hh, b1,
      params["w2_ih"], params["w2_hh"], params["b2"],
      wl_pad, bl_pad)
    return y_pad[:, :n_features]


def init_params(key, input_dim, n_features=1):
    D = input_dim
    H2 = 2 * D
    k1 = 1.0 / np.sqrt(D)
    k2 = 1.0 / np.sqrt(H2)
    kl = 1.0 / np.sqrt(H2)
    keys = jax.random.split(key, 14)

    def u(k, shape, s):
        return jax.random.uniform(k, shape, jnp.float32, -s, s)

    return {
        # rnn1 forward direction (torch weight_ih_l0 is (4H, D); stored transposed)
        "w1f_ih": u(keys[0], (D, 4 * D), k1),
        "w1f_hh": u(keys[1], (D, 4 * D), k1),
        "b1f":    u(keys[2], (1, 4 * D), k1) + u(keys[3], (1, 4 * D), k1),
        # rnn1 backward direction
        "w1b_ih": u(keys[4], (D, 4 * D), k1),
        "w1b_hh": u(keys[5], (D, 4 * D), k1),
        "b1b":    u(keys[6], (1, 4 * D), k1) + u(keys[7], (1, 4 * D), k1),
        # rnn2
        "w2_ih":  u(keys[8], (H2, 4 * H2), k2),
        "w2_hh":  u(keys[9], (H2, 4 * H2), k2),
        "b2":     u(keys[10], (1, 4 * H2), k2) + u(keys[11], (1, 4 * H2), k2),
        # output linear
        "wl":     u(keys[12], (H2, n_features), kl),
        "bl":     u(keys[13], (1, n_features), kl),
    }


# ---- pure-JAX reference (for correctness check only) ------------------------
def _lstm_ref(x_seq, w_ih, w_hh, b, hidden):
    S = x_seq.shape[0]
    h = jnp.zeros((1, hidden), jnp.float32)
    c = jnp.zeros((1, hidden), jnp.float32)
    pre_all = x_seq @ w_ih + b
    outs = []
    for t in range(S):
        gates = pre_all[t:t + 1] + h @ w_hh
        i = jax.nn.sigmoid(gates[:, :hidden])
        f = jax.nn.sigmoid(gates[:, hidden:2 * hidden])
        g = jnp.tanh(gates[:, 2 * hidden:3 * hidden])
        o = jax.nn.sigmoid(gates[:, 3 * hidden:])
        c = f * c + i * g
        h = o * jnp.tanh(c)
        outs.append(h)
    return jnp.concatenate(outs, axis=0)


def decoder_ref(x, params, seq_len, input_dim, n_features=1):
    D = input_dim
    H2 = 2 * D
    x_seq = jnp.tile(x, (seq_len, n_features)).reshape(
        (n_features, seq_len, D))[0]
    hf = _lstm_ref(x_seq, params["w1f_ih"], params["w1f_hh"], params["b1f"], D)
    hb = _lstm_ref(x_seq[::-1], params["w1b_ih"], params["w1b_hh"],
                   params["b1b"], D)[::-1]
    out1 = jnp.concatenate([hf, hb], axis=1)
    h2 = _lstm_ref(out1, params["w2_ih"], params["w2_hh"], params["b2"], H2)
    return h2 @ params["wl"] + params["bl"]


if __name__ == "__main__":
    seq_len, input_dim, n_features = 8, 32, 1
    key = jax.random.PRNGKey(0)
    k_x, k_p = jax.random.split(key)

    x = jax.random.normal(k_x, (1, input_dim), jnp.float32)  # latent vector
    params = init_params(k_p, input_dim, n_features)

    y = decoder_forward(x, params, seq_len, input_dim, n_features)
    y = jax.block_until_ready(y)
    assert y.shape == (seq_len, n_features)

    y_ref = decoder_ref(x, params, seq_len, input_dim, n_features)
    np.testing.assert_allclose(np.asarray(y), np.asarray(y_ref),
                               rtol=2e-2, atol=2e-2)
    print("KERNEL_OK")
</pallas_src>

<mosaic_0001>
module attributes {stable_mosaic.version = 11 : i64} {
  func.func @decoder_kernel(%arg0: memref<1x32xf32, #tpu.memory_space<vmem>>, %arg1: memref<32x256xf32, #tpu.memory_space<vmem>>, %arg2: memref<64x256xf32, #tpu.memory_space<vmem>>, %arg3: memref<1x256xf32, #tpu.memory_space<vmem>>, %arg4: memref<64x256xf32, #tpu.memory_space<vmem>>, %arg5: memref<64x256xf32, #tpu.memory_space<vmem>>, %arg6: memref<1x256xf32, #tpu.memory_space<vmem>>, %arg7: memref<64x128xf32, #tpu.memory_space<vmem>>, %arg8: memref<1x128xf32, #tpu.memory_space<vmem>>, %arg9: memref<8x128xf32, #tpu.memory_space<vmem>>, %arg10: memref<8x32xf32, #tpu.memory_space<vmem>>, %arg11: memref<8x32xf32, #tpu.memory_space<vmem>>, %arg12: memref<8x256xf32, #tpu.memory_space<vmem>>, %arg13: memref<8x64xf32, #tpu.memory_space<vmem>>) attributes {dimension_semantics = [], scalar_prefetch = 0 : i64, scratch_operands = 4 : i64, tpu.core_type = #tpu.core_type<tc>} {
    %c0 = arith.constant 0 : index
    %c0_0 = arith.constant 0 : index
    %0 = vector.load %arg0[%c0, %c0_0] : memref<1x32xf32, #tpu.memory_space<vmem>>, vector<1x32xf32>
    %c0_1 = arith.constant 0 : index
    %c0_2 = arith.constant 0 : index
    %1 = vector.load %arg1[%c0_1, %c0_2] : memref<32x256xf32, #tpu.memory_space<vmem>>, vector<32x256xf32>
    %cst = arith.constant dense<0.000000e+00> : vector<1x256xf32>
    %2 = tpu.matmul %0, %1, %cst {dimension_numbers = #tpu.dot_dimension_numbers<[1], [0], [0], [1], [0, 0, 1, 1], [], []>} : vector<1x32xf32>, vector<32x256xf32>, vector<1x256xf32> -> vector<1x256xf32>
    %c0_3 = arith.constant 0 : index
    %c0_4 = arith.constant 0 : index
    %3 = vector.load %arg3[%c0_3, %c0_4] : memref<1x256xf32, #tpu.memory_space<vmem>>, vector<1x256xf32>
    %4 = arith.addf %2, %3 : vector<1x256xf32>
    %cst_5 = arith.constant 0.000000e+00 : f32
    %5 = vector.broadcast %cst_5 : f32 to vector<1x64xf32>
    %cst_6 = arith.constant 0.000000e+00 : f32
    %6 = vector.broadcast %cst_6 : f32 to vector<1x64xf32>
    %c0_7 = arith.constant 0 : index
    %c0_8 = arith.constant 0 : index
    %7 = vector.load %arg2[%c0_7, %c0_8] : memref<64x256xf32, #tpu.memory_space<vmem>>, vector<64x256xf32>
    %cst_9 = arith.constant dense<0.000000e+00> : vector<1x256xf32>
    %8 = tpu.matmul %5, %7, %cst_9 {dimension_numbers = #tpu.dot_dimension_numbers<[1], [0], [0], [1], [0, 0, 1, 1], [], []>} : vector<1x64xf32>, vector<64x256xf32>, vector<1x256xf32> -> vector<1x256xf32>
    %9 = arith.addf %4, %8 : vector<1x256xf32>
    %10 = vector.extract_strided_slice %9 {offsets = [0, 0], sizes = [1, 64], strides = [1, 1]} : vector<1x256xf32> to vector<1x64xf32>
    %11 = arith.negf %10 : vector<1x64xf32>
    %12 = math.exp %11 : vector<1x64xf32>
    %cst_10 = arith.constant 1.000000e+00 : f32
    %13 = vector.broadcast %cst_10 : f32 to vector<1x64xf32>
    %14 = arith.addf %13, %12 : vector<1x64xf32>
    %15 = arith.divf %13, %14 : vector<1x64xf32>
    %16 = vector.extract_strided_slice %9 {offsets = [0, 64], sizes = [1, 64], strides = [1, 1]} : vector<1x256xf32> to vector<1x64xf32>
    %17 = arith.negf %16 : vector<1x64xf32>
    %18 = math.exp %17 : vector<1x64xf32>
    %cst_11 = arith.constant 1.000000e+00 : f32
    %19 = vector.broadcast %cst_11 : f32 to vector<1x64xf32>
    %20 = arith.addf %19, %18 : vector<1x64xf32>
    %21 = arith.divf %19, %20 : vector<1x64xf32>
    %22 = vector.extract_strided_slice %9 {offsets = [0, 128], sizes = [1, 64], strides = [1, 1]} : vector<1x256xf32> to vector<1x64xf32>
    %23 = math.tanh %22 : vector<1x64xf32>
    %24 = vector.extract_strided_slice %9 {offsets = [0, 192], sizes = [1, 64], strides = [1, 1]} : vector<1x256xf32> to vector<1x64xf32>
    %25 = arith.negf %24 : vector<1x64xf32>
    %26 = math.exp %25 : vector<1x64xf32>
    %cst_12 = arith.constant 1.000000e+00 : f32
    %27 = vector.broadcast %cst_12 : f32 to vector<1x64xf32>
    %28 = arith.addf %27, %26 : vector<1x64xf32>
    %29 = arith.divf %27, %28 : vector<1x64xf32>
    %30 = arith.mulf %21, %6 : vector<1x64xf32>
    %31 = arith.mulf %15, %23 : vector<1x64xf32>
    %32 = arith.addf %30, %31 : vector<1x64xf32>
    %33 = math.tanh %32 : vector<1x64xf32>
    %34 = arith.mulf %29, %33 : vector<1x64xf32>
    %35 = vector.extract_strided_slice %34 {offsets = [0, 0], sizes = [1, 32], strides = [1, 1]} : vector<1x64xf32> to vector<1x32xf32>
    %c0_13 = arith.constant 0 : index
    %c0_14 = arith.constant 0 : index
    %36 = vector.load %arg10[%c0_13, %c0_14] : memref<8x32xf32, #tpu.memory_space<vmem>>, vector<1x32xf32>
    tpu.vector_store %arg10[%c0_13, %c0_14], %35 {strides = array<i32>} : memref<8x32xf32, #tpu.memory_space<vmem>>, vector<1x32xf32>,
    %37 = vector.extract_strided_slice %34 {offsets = [0, 32], sizes = [1, 32], strides = [1, 1]} : vector<1x64xf32> to vector<1x32xf32>
    %c7 = arith.constant 7 : index
    %c0_15 = arith.constant 0 : index
    %38 = vector.load %arg11[%c7, %c0_15] : memref<8x32xf32, #tpu.memory_space<vmem>>, vector<1x32xf32>
    tpu.vector_store %arg11[%c7, %c0_15], %37 {strides = array<i32>} : memref<8x32xf32, #tpu.memory_space<vmem>>, vector<1x32xf32>,
    %c0_16 = arith.constant 0 : index
    %c0_17 = arith.constant 0 : index
    %39 = vector.load %arg2[%c0_16, %c0_17] : memref<64x256xf32, #tpu.memory_space<vmem>>, vector<64x256xf32>
    %cst_18 = arith.constant dense<0.000000e+00> : vector<1x256xf32>
    %40 = tpu.matmul %34, %39, %cst_18 {dimension_numbers = #tpu.dot_dimension_numbers<[1], [0], [0], [1], [0, 0, 1, 1], [], []>} : vector<1x64xf32>, vector<64x256xf32>, vector<1x256xf32> -> vector<1x256xf32>
    %41 = arith.addf %4, %40 : vector<1x256xf32>
    %42 = vector.extract_strided_slice %41 {offsets = [0, 0], sizes = [1, 64], strides = [1, 1]} : vector<1x256xf32> to vector<1x64xf32>
    %43 = arith.negf %42 : vector<1x64xf32>
    %44 = math.exp %43 : vector<1x64xf32>
    %cst_19 = arith.constant 1.000000e+00 : f32
    %45 = vector.broadcast %cst_19 : f32 to vector<1x64xf32>
    %46 = arith.addf %45, %44 : vector<1x64xf32>
    %47 = arith.divf %45, %46 : vector<1x64xf32>
    %48 = vector.extract_strided_slice %41 {offsets = [0, 64], sizes = [1, 64], strides = [1, 1]} : vector<1x256xf32> to vector<1x64xf32>
    %49 = arith.negf %48 : vector<1x64xf32>
    %50 = math.exp %49 : vector<1x64xf32>
    %cst_20 = arith.constant 1.000000e+00 : f32
    %51 = vector.broadcast %cst_20 : f32 to vector<1x64xf32>
    %52 = arith.addf %51, %50 : vector<1x64xf32>
    %53 = arith.divf %51, %52 : vector<1x64xf32>
    %54 = vector.extract_strided_slice %41 {offsets = [0, 128], sizes = [1, 64], strides = [1, 1]} : vector<1x256xf32> to vector<1x64xf32>
    %55 = math.tanh %54 : vector<1x64xf32>
    %56 = vector.extract_strided_slice %41 {offsets = [0, 192], sizes = [1, 64], strides = [1, 1]} : vector<1x256xf32> to vector<1x64xf32>
    %57 = arith.negf %56 : vector<1x64xf32>
    %58 = math.exp %57 : vector<1x64xf32>
    %cst_21 = arith.constant 1.000000e+00 : f32
    %59 = vector.broadcast %cst_21 : f32 to vector<1x64xf32>
    %60 = arith.addf %59, %58 : vector<1x64xf32>
    %61 = arith.divf %59, %60 : vector<1x64xf32>
    %62 = arith.mulf %53, %32 : vector<1x64xf32>
    %63 = arith.mulf %47, %55 : vector<1x64xf32>
    %64 = arith.addf %62, %63 : vector<1x64xf32>
    %65 = math.tanh %64 : vector<1x64xf32>
    %66 = arith.mulf %61, %65 : vector<1x64xf32>
    %67 = vector.extract_strided_slice %66 {offsets = [0, 0], sizes = [1, 32], strides = [1, 1]} : vector<1x64xf32> to vector<1x32xf32>
    %c1 = arith.constant 1 : index
    %c0_22 = arith.constant 0 : index
    %68 = vector.load %arg10[%c1, %c0_22] : memref<8x32xf32, #tpu.memory_space<vmem>>, vector<1x32xf32>
    tpu.vector_store %arg10[%c1, %c0_22], %67 {strides = array<i32>} : memref<8x32xf32, #tpu.memory_space<vmem>>, vector<1x32xf32>,
    %69 = vector.extract_strided_slice %66 {offsets = [0, 32], sizes = [1, 32], strides = [1, 1]} : vector<1x64xf32> to vector<1x32xf32>
    %c6 = arith.constant 6 : index
    %c0_23 = arith.constant 0 : index
    %70 = vector.load %arg11[%c6, %c0_23] : memref<8x32xf32, #tpu.memory_space<vmem>>, vector<1x32xf32>
    tpu.vector_store %arg11[%c6, %c0_23], %69 {strides = array<i32>} : memref<8x32xf32, #tpu.memory_space<vmem>>, vector<1x32xf32>,
    %c0_24 = arith.constant 0 : index
    %c0_25 = arith.constant 0 : index
    %71 = vector.load %arg2[%c0_24, %c0_25] : memref<64x256xf32, #tpu.memory_space<vmem>>, vector<64x256xf32>
    %cst_26 = arith.constant dense<0.000000e+00> : vector<1x256xf32>
    %72 = tpu.matmul %66, %71, %cst_26 {dimension_numbers = #tpu.dot_dimension_numbers<[1], [0], [0], [1], [0, 0, 1, 1], [], []>} : vector<1x64xf32>, vector<64x256xf32>, vector<1x256xf32> -> vector<1x256xf32>
    %73 = arith.addf %4, %72 : vector<1x256xf32>
    %74 = vector.extract_strided_slice %73 {offsets = [0, 0], sizes = [1, 64], strides = [1, 1]} : vector<1x256xf32> to vector<1x64xf32>
    %75 = arith.negf %74 : vector<1x64xf32>
    %76 = math.exp %75 : vector<1x64xf32>
    %cst_27 = arith.constant 1.000000e+00 : f32
    %77 = vector.broadcast %cst_27 : f32 to vector<1x64xf32>
    %78 = arith.addf %77, %76 : vector<1x64xf32>
    %79 = arith.divf %77, %78 : vector<1x64xf32>
    %80 = vector.extract_strided_slice %73 {offsets = [0, 64], sizes = [1, 64], strides = [1, 1]} : vector<1x256xf32> to vector<1x64xf32>
    %81 = arith.negf %80 : vector<1x64xf32>
    %82 = math.exp %81 : vector<1x64xf32>
    %cst_28 = arith.constant 1.000000e+00 : f32
    %83 = vector.broadcast %cst_28 : f32 to vector<1x64xf32>
    %84 = arith.addf %83, %82 : vector<1x64xf32>
    %85 = arith.divf %83, %84 : vector<1x64xf32>
    %86 = vector.extract_strided_slice %73 {offsets = [0, 128], sizes = [1, 64], strides = [1, 1]} : vector<1x256xf32> to vector<1x64xf32>
    %87 = math.tanh %86 : vector<1x64xf32>
    %88 = vector.extract_strided_slice %73 {offsets = [0, 192], sizes = [1, 64], strides = [1, 1]} : vector<1x256xf32> to vector<1x64xf32>
    %89 = arith.negf %88 : vector<1x64xf32>
    %90 = math.exp %89 : vector<1x64xf32>
    %cst_29 = arith.constant 1.000000e+00 : f32
    %91 = vector.broadcast %cst_29 : f32 to vector<1x64xf32>
    %92 = arith.addf %91, %90 : vector<1x64xf32>
    %93 = arith.divf %91, %92 : vector<1x64xf32>
    %94 = arith.mulf %85, %64 : vector<1x64xf32>
    %95 = arith.mulf %79, %87 : vector<1x64xf32>
    %96 = arith.addf %94, %95 : vector<1x64xf32>
    %97 = math.tanh %96 : vector<1x64xf32>
    %98 = arith.mulf %93, %97 : vector<1x64xf32>
    %99 = vector.extract_strided_slice %98 {offsets = [0, 0], sizes = [1, 32], strides = [1, 1]} : vector<1x64xf32> to vector<1x32xf32>
    %c2 = arith.constant 2 : index
    %c0_30 = arith.constant 0 : index
    %100 = vector.load %arg10[%c2, %c0_30] : memref<8x32xf32, #tpu.memory_space<vmem>>, vector<1x32xf32>
    tpu.vector_store %arg10[%c2, %c0_30], %99 {strides = array<i32>} : memref<8x32xf32, #tpu.memory_space<vmem>>, vector<1x32xf32>,
    %101 = vector.extract_strided_slice %98 {offsets = [0, 32], sizes = [1, 32], strides = [1, 1]} : vector<1x64xf32> to vector<1x32xf32>
    %c5 = arith.constant 5 : index
    %c0_31 = arith.constant 0 : index
    %102 = vector.load %arg11[%c5, %c0_31] : memref<8x32xf32, #tpu.memory_space<vmem>>, vector<1x32xf32>
    tpu.vector_store %arg11[%c5, %c0_31], %101 {strides = array<i32>} : memref<8x32xf32, #tpu.memory_space<vmem>>, vector<1x32xf32>,
    %c0_32 = arith.constant 0 : index
    %c0_33 = arith.constant 0 : index
    %103 = vector.load %arg2[%c0_32, %c0_33] : memref<64x256xf32, #tpu.memory_space<vmem>>, vector<64x256xf32>
    %cst_34 = arith.constant dense<0.000000e+00> : vector<1x256xf32>
    %104 = tpu.matmul %98, %103, %cst_34 {dimension_numbers = #tpu.dot_dimension_numbers<[1], [0], [0], [1], [0, 0, 1, 1], [], []>} : vector<1x64xf32>, vector<64x256xf32>, vector<1x256xf32> -> vector<1x256xf32>
    %105 = arith.addf %4, %104 : vector<1x256xf32>
    %106 = vector.extract_strided_slice %105 {offsets = [0, 0], sizes = [1, 64], strides = [1, 1]} : vector<1x256xf32> to vector<1x64xf32>
    %107 = arith.negf %106 : vector<1x64xf32>
    %108 = math.exp %107 : vector<1x64xf32>
    %cst_35 = arith.constant 1.000000e+00 : f32
    %109 = vector.broadcast %cst_35 : f32 to vector<1x64xf32>
    %110 = arith.addf %109, %108 : vector<1x64xf32>
    %111 = arith.divf %109, %110 : vector<1x64xf32>
    %112 = vector.extract_strided_slice %105 {offsets = [0, 64], sizes = [1, 64], strides = [1, 1]} : vector<1x256xf32> to vector<1x64xf32>
    %113 = arith.negf %112 : vector<1x64xf32>
    %114 = math.exp %113 : vector<1x64xf32>
    %cst_36 = arith.constant 1.000000e+00 : f32
    %115 = vector.broadcast %cst_36 : f32 to vector<1x64xf32>
    %116 = arith.addf %115, %114 : vector<1x64xf32>
    %117 = arith.divf %115, %116 : vector<1x64xf32>
    %118 = vector.extract_strided_slice %105 {offsets = [0, 128], sizes = [1, 64], strides = [1, 1]} : vector<1x256xf32> to vector<1x64xf32>
    %119 = math.tanh %118 : vector<1x64xf32>
    %120 = vector.extract_strided_slice %105 {offsets = [0, 192], sizes = [1, 64], strides = [1, 1]} : vector<1x256xf32> to vector<1x64xf32>
    %121 = arith.negf %120 : vector<1x64xf32>
    %122 = math.exp %121 : vector<1x64xf32>
    %cst_37 = arith.constant 1.000000e+00 : f32
    %123 = vector.broadcast %cst_37 : f32 to vector<1x64xf32>
    %124 = arith.addf %123, %122 : vector<1x64xf32>
    %125 = arith.divf %123, %124 : vector<1x64xf32>
    %126 = arith.mulf %117, %96 : vector<1x64xf32>
    %127 = arith.mulf %111, %119 : vector<1x64xf32>
    %128 = arith.addf %126, %127 : vector<1x64xf32>
    %129 = math.tanh %128 : vector<1x64xf32>
    %130 = arith.mulf %125, %129 : vector<1x64xf32>
    %131 = vector.extract_strided_slice %130 {offsets = [0, 0], sizes = [1, 32], strides = [1, 1]} : vector<1x64xf32> to vector<1x32xf32>
    %c3 = arith.constant 3 : index
    %c0_38 = arith.constant 0 : index
    %132 = vector.load %arg10[%c3, %c0_38] : memref<8x32xf32, #tpu.memory_space<vmem>>, vector<1x32xf32>
    tpu.vector_store %arg10[%c3, %c0_38], %131 {strides = array<i32>} : memref<8x32xf32, #tpu.memory_space<vmem>>, vector<1x32xf32>,
    %133 = vector.extract_strided_slice %130 {offsets = [0, 32], sizes = [1, 32], strides = [1, 1]} : vector<1x64xf32> to vector<1x32xf32>
    %c4 = arith.constant 4 : index
    %c0_39 = arith.constant 0 : index
    %134 = vector.load %arg11[%c4, %c0_39] : memref<8x32xf32, #tpu.memory_space<vmem>>, vector<1x32xf32>
    tpu.vector_store %arg11[%c4, %c0_39], %133 {strides = array<i32>} : memref<8x32xf32, #tpu.memory_space<vmem>>, vector<1x32xf32>,
    %c0_40 = arith.constant 0 : index
    %c0_41 = arith.constant 0 : index
    %135 = vector.load %arg2[%c0_40, %c0_41] : memref<64x256xf32, #tpu.memory_space<vmem>>, vector<64x256xf32>
    %cst_42 = arith.constant dense<0.000000e+00> : vector<1x256xf32>
    %136 = tpu.matmul %130, %135, %cst_42 {dimension_numbers = #tpu.dot_dimension_numbers<[1], [0], [0], [1], [0, 0, 1, 1], [], []>} : vector<1x64xf32>, vector<64x256xf32>, vector<1x256xf32> -> vector<1x256xf32>
    %137 = arith.addf %4, %136 : vector<1x256xf32>
    %138 = vector.extract_strided_slice %137 {offsets = [0, 0], sizes = [1, 64], strides = [1, 1]} : vector<1x256xf32> to vector<1x64xf32>
    %139 = arith.negf %138 : vector<1x64xf32>
    %140 = math.exp %139 : vector<1x64xf32>
    %cst_43 = arith.constant 1.000000e+00 : f32
    %141 = vector.broadcast %cst_43 : f32 to vector<1x64xf32>
    %142 = arith.addf %141, %140 : vector<1x64xf32>
    %143 = arith.divf %141, %142 : vector<1x64xf32>
    %144 = vector.extract_strided_slice %137 {offsets = [0, 64], sizes = [1, 64], strides = [1, 1]} : vector<1x256xf32> to vector<1x64xf32>
    %145 = arith.negf %144 : vector<1x64xf32>
    %146 = math.exp %145 : vector<1x64xf32>
    %cst_44 = arith.constant 1.000000e+00 : f32
    %147 = vector.broadcast %cst_44 : f32 to vector<1x64xf32>
    %148 = arith.addf %147, %146 : vector<1x64xf32>
    %149 = arith.divf %147, %148 : vector<1x64xf32>
    %150 = vector.extract_strided_slice %137 {offsets = [0, 128], sizes = [1, 64], strides = [1, 1]} : vector<1x256xf32> to vector<1x64xf32>
    %151 = math.tanh %150 : vector<1x64xf32>
    %152 = vector.extract_strided_slice %137 {offsets = [0, 192], sizes = [1, 64], strides = [1, 1]} : vector<1x256xf32> to vector<1x64xf32>
    %153 = arith.negf %152 : vector<1x64xf32>
    %154 = math.exp %153 : vector<1x64xf32>
    %cst_45 = arith.constant 1.000000e+00 : f32
    %155 = vector.broadcast %cst_45 : f32 to vector<1x64xf32>
    %156 = arith.addf %155, %154 : vector<1x64xf32>
    %157 = arith.divf %155, %156 : vector<1x64xf32>
    %158 = arith.mulf %149, %128 : vector<1x64xf32>
    %159 = arith.mulf %143, %151 : vector<1x64xf32>
    %160 = arith.addf %158, %159 : vector<1x64xf32>
    %161 = math.tanh %160 : vector<1x64xf32>
    %162 = arith.mulf %157, %161 : vector<1x64xf32>
    %163 = vector.extract_strided_slice %162 {offsets = [0, 0], sizes = [1, 32], strides = [1, 1]} : vector<1x64xf32> to vector<1x32xf32>
    %c4_46 = arith.constant 4 : index
    %c0_47 = arith.constant 0 : index
    %164 = vector.load %arg10[%c4_46, %c0_47] : memref<8x32xf32, #tpu.memory_space<vmem>>, vector<1x32xf32>
    tpu.vector_store %arg10[%c4_46, %c0_47], %163 {strides = array<i32>} : memref<8x32xf32, #tpu.memory_space<vmem>>, vector<1x32xf32>,
    %165 = vector.extract_strided_slice %162 {offsets = [0, 32], sizes = [1, 32], strides = [1, 1]} : vector<1x64xf32> to vector<1x32xf32>
    %c3_48 = arith.constant 3 : index
    %c0_49 = arith.constant 0 : index
    %166 = vector.load %arg11[%c3_48, %c0_49] : memref<8x32xf32, #tpu.memory_space<vmem>>, vector<1x32xf32>
    tpu.vector_store %arg11[%c3_48, %c0_49], %165 {strides = array<i32>} : memref<8x32xf32, #tpu.memory_space<vmem>>, vector<1x32xf32>,
    %c0_50 = arith.constant 0 : index
    %c0_51 = arith.constant 0 : index
    %167 = vector.load %arg2[%c0_50, %c0_51] : memref<64x256xf32, #tpu.memory_space<vmem>>, vector<64x256xf32>
    %cst_52 = arith.constant dense<0.000000e+00> : vector<1x256xf32>
    %168 = tpu.matmul %162, %167, %cst_52 {dimension_numbers = #tpu.dot_dimension_numbers<[1], [0], [0], [1], [0, 0, 1, 1], [], []>} : vector<1x64xf32>, vector<64x256xf32>, vector<1x256xf32> -> vector<1x256xf32>
    %169 = arith.addf %4, %168 : vector<1x256xf32>
    %170 = vector.extract_strided_slice %169 {offsets = [0, 0], sizes = [1, 64], strides = [1, 1]} : vector<1x256xf32> to vector<1x64xf32>
    %171 = arith.negf %170 : vector<1x64xf32>
    %172 = math.exp %171 : vector<1x64xf32>
    %cst_53 = arith.constant 1.000000e+00 : f32
    %173 = vector.broadcast %cst_53 : f32 to vector<1x64xf32>
    %174 = arith.addf %173, %172 : vector<1x64xf32>
    %175 = arith.divf %173, %174 : vector<1x64xf32>
    %176 = vector.extract_strided_slice %169 {offsets = [0, 64], sizes = [1, 64], strides = [1, 1]} : vector<1x256xf32> to vector<1x64xf32>
    %177 = arith.negf %176 : vector<1x64xf32>
    %178 = math.exp %177 : vector<1x64xf32>
    %cst_54 = arith.constant 1.000000e+00 : f32
    %179 = vector.broadcast %cst_54 : f32 to vector<1x64xf32>
    %180 = arith.addf %179, %178 : vector<1x64xf32>
    %181 = arith.divf %179, %180 : vector<1x64xf32>
    %182 = vector.extract_strided_slice %169 {offsets = [0, 128], sizes = [1, 64], strides = [1, 1]} : vector<1x256xf32> to vector<1x64xf32>
    %183 = math.tanh %182 : vector<1x64xf32>
    %184 = vector.extract_strided_slice %169 {offsets = [0, 192], sizes = [1, 64], strides = [1, 1]} : vector<1x256xf32> to vector<1x64xf32>
    %185 = arith.negf %184 : vector<1x64xf32>
    %186 = math.exp %185 : vector<1x64xf32>
    %cst_55 = arith.constant 1.000000e+00 : f32
    %187 = vector.broadcast %cst_55 : f32 to vector<1x64xf32>
    %188 = arith.addf %187, %186 : vector<1x64xf32>
    %189 = arith.divf %187, %188 : vector<1x64xf32>
    %190 = arith.mulf %181, %160 : vector<1x64xf32>
    %191 = arith.mulf %175, %183 : vector<1x64xf32>
    %192 = arith.addf %190, %191 : vector<1x64xf32>
    %193 = math.tanh %192 : vector<1x64xf32>
    %194 = arith.mulf %189, %193 : vector<1x64xf32>
    %195 = vector.extract_strided_slice %194 {offsets = [0, 0], sizes = [1, 32], strides = [1, 1]} : vector<1x64xf32> to vector<1x32xf32>
    %c5_56 = arith.constant 5 : index
    %c0_57 = arith.constant 0 : index
    %196 = vector.load %arg10[%c5_56, %c0_57] : memref<8x32xf32, #tpu.memory_space<vmem>>, vector<1x32xf32>
    tpu.vector_store %arg10[%c5_56, %c0_57], %195 {strides = array<i32>} : memref<8x32xf32, #tpu.memory_space<vmem>>, vector<1x32xf32>,
    %197 = vector.extract_strided_slice %194 {offsets = [0, 32], sizes = [1, 32], strides = [1, 1]} : vector<1x64xf32> to vector<1x32xf32>
    %c2_58 = arith.constant 2 : index
    %c0_59 = arith.constant 0 : index
    %198 = vector.load %arg11[%c2_58, %c0_59] : memref<8x32xf32, #tpu.memory_space<vmem>>, vector<1x32xf32>
    tpu.vector_store %arg11[%c2_58, %c0_59], %197 {strides = array<i32>} : memref<8x32xf32, #tpu.memory_space<vmem>>, vector<1x32xf32>,
    %c0_60 = arith.constant 0 : index
    %c0_61 = arith.constant 0 : index
    %199 = vector.load %arg2[%c0_60, %c0_61] : memref<64x256xf32, #tpu.memory_space<vmem>>, vector<64x256xf32>
    %cst_62 = arith.constant dense<0.000000e+00> : vector<1x256xf32>
    %200 = tpu.matmul %194, %199, %cst_62 {dimension_numbers = #tpu.dot_dimension_numbers<[1], [0], [0], [1], [0, 0, 1, 1], [], []>} : vector<1x64xf32>, vector<64x256xf32>, vector<1x256xf32> -> vector<1x256xf32>
    %201 = arith.addf %4, %200 : vector<1x256xf32>
    %202 = vector.extract_strided_slice %201 {offsets = [0, 0], sizes = [1, 64], strides = [1, 1]} : vector<1x256xf32> to vector<1x64xf32>
    %203 = arith.negf %202 : vector<1x64xf32>
    %204 = math.exp %203 : vector<1x64xf32>
    %cst_63 = arith.constant 1.000000e+00 : f32
    %205 = vector.broadcast %cst_63 : f32 to vector<1x64xf32>
    %206 = arith.addf %205, %204 : vector<1x64xf32>
    %207 = arith.divf %205, %206 : vector<1x64xf32>
    %208 = vector.extract_strided_slice %201 {offsets = [0, 64], sizes = [1, 64], strides = [1, 1]} : vector<1x256xf32> to vector<1x64xf32>
    %209 = arith.negf %208 : vector<1x64xf32>
    %210 = math.exp %209 : vector<1x64xf32>
    %cst_64 = arith.constant 1.000000e+00 : f32
    %211 = vector.broadcast %cst_64 : f32 to vector<1x64xf32>
    %212 = arith.addf %211, %210 : vector<1x64xf32>
    %213 = arith.divf %211, %212 : vector<1x64xf32>
    %214 = vector.extract_strided_slice %201 {offsets = [0, 128], sizes = [1, 64], strides = [1, 1]} : vector<1x256xf32> to vector<1x64xf32>
    %215 = math.tanh %214 : vector<1x64xf32>
    %216 = vector.extract_strided_slice %201 {offsets = [0, 192], sizes = [1, 64], strides = [1, 1]} : vector<1x256xf32> to vector<1x64xf32>
    %217 = arith.negf %216 : vector<1x64xf32>
    %218 = math.exp %217 : vector<1x64xf32>
    %cst_65 = arith.constant 1.000000e+00 : f32
    %219 = vector.broadcast %cst_65 : f32 to vector<1x64xf32>
    %220 = arith.addf %219, %218 : vector<1x64xf32>
    %221 = arith.divf %219, %220 : vector<1x64xf32>
    %222 = arith.mulf %213, %192 : vector<1x64xf32>
    %223 = arith.mulf %207, %215 : vector<1x64xf32>
    %224 = arith.addf %222, %223 : vector<1x64xf32>
    %225 = math.tanh %224 : vector<1x64xf32>
    %226 = arith.mulf %221, %225 : vector<1x64xf32>
    %227 = vector.extract_strided_slice %226 {offsets = [0, 0], sizes = [1, 32], strides = [1, 1]} : vector<1x64xf32> to vector<1x32xf32>
    %c6_66 = arith.constant 6 : index
    %c0_67 = arith.constant 0 : index
    %228 = vector.load %arg10[%c6_66, %c0_67] : memref<8x32xf32, #tpu.memory_space<vmem>>, vector<1x32xf32>
    tpu.vector_store %arg10[%c6_66, %c0_67], %227 {strides = array<i32>} : memref<8x32xf32, #tpu.memory_space<vmem>>, vector<1x32xf32>,
    %229 = vector.extract_strided_slice %226 {offsets = [0, 32], sizes = [1, 32], strides = [1, 1]} : vector<1x64xf32> to vector<1x32xf32>
    %c1_68 = arith.constant 1 : index
    %c0_69 = arith.constant 0 : index
    %230 = vector.load %arg11[%c1_68, %c0_69] : memref<8x32xf32, #tpu.memory_space<vmem>>, vector<1x32xf32>
    tpu.vector_store %arg11[%c1_68, %c0_69], %229 {strides = array<i32>} : memref<8x32xf32, #tpu.memory_space<vmem>>, vector<1x32xf32>,
    %c0_70 = arith.constant 0 : index
    %c0_71 = arith.constant 0 : index
    %231 = vector.load %arg2[%c0_70, %c0_71] : memref<64x256xf32, #tpu.memory_space<vmem>>, vector<64x256xf32>
    %cst_72 = arith.constant dense<0.000000e+00> : vector<1x256xf32>
    %232 = tpu.matmul %226, %231, %cst_72 {dimension_numbers = #tpu.dot_dimension_numbers<[1], [0], [0], [1], [0, 0, 1, 1], [], []>} : vector<1x64xf32>, vector<64x256xf32>, vector<1x256xf32> -> vector<1x256xf32>
    %233 = arith.addf %4, %232 : vector<1x256xf32>
    %234 = vector.extract_strided_slice %233 {offsets = [0, 0], sizes = [1, 64], strides = [1, 1]} : vector<1x256xf32> to vector<1x64xf32>
    %235 = arith.negf %234 : vector<1x64xf32>
    %236 = math.exp %235 : vector<1x64xf32>
    %cst_73 = arith.constant 1.000000e+00 : f32
    %237 = vector.broadcast %cst_73 : f32 to vector<1x64xf32>
    %238 = arith.addf %237, %236 : vector<1x64xf32>
    %239 = arith.divf %237, %238 : vector<1x64xf32>
    %240 = vector.extract_strided_slice %233 {offsets = [0, 64], sizes = [1, 64], strides = [1, 1]} : vector<1x256xf32> to vector<1x64xf32>
    %241 = arith.negf %240 : vector<1x64xf32>
    %242 = math.exp %241 : vector<1x64xf32>
    %cst_74 = arith.constant 1.000000e+00 : f32
    %243 = vector.broadcast %cst_74 : f32 to vector<1x64xf32>
    %244 = arith.addf %243, %242 : vector<1x64xf32>
    %245 = arith.divf %243, %244 : vector<1x64xf32>
    %246 = vector.extract_strided_slice %233 {offsets = [0, 128], sizes = [1, 64], strides = [1, 1]} : vector<1x256xf32> to vector<1x64xf32>
    %247 = math.tanh %246 : vector<1x64xf32>
    %248 = vector.extract_strided_slice %233 {offsets = [0, 192], sizes = [1, 64], strides = [1, 1]} : vector<1x256xf32> to vector<1x64xf32>
    %249 = arith.negf %248 : vector<1x64xf32>
    %250 = math.exp %249 : vector<1x64xf32>
    %cst_75 = arith.constant 1.000000e+00 : f32
    %251 = vector.broadcast %cst_75 : f32 to vector<1x64xf32>
    %252 = arith.addf %251, %250 : vector<1x64xf32>
    %253 = arith.divf %251, %252 : vector<1x64xf32>
    %254 = arith.mulf %245, %224 : vector<1x64xf32>
    %255 = arith.mulf %239, %247 : vector<1x64xf32>
    %256 = arith.addf %254, %255 : vector<1x64xf32>
    %257 = math.tanh %256 : vector<1x64xf32>
    %258 = arith.mulf %253, %257 : vector<1x64xf32>
    %259 = vector.extract_strided_slice %258 {offsets = [0, 0], sizes = [1, 32], strides = [1, 1]} : vector<1x64xf32> to vector<1x32xf32>
    %c7_76 = arith.constant 7 : index
    %c0_77 = arith.constant 0 : index
    %260 = vector.load %arg10[%c7_76, %c0_77] : memref<8x32xf32, #tpu.memory_space<vmem>>, vector<1x32xf32>
    tpu.vector_store %arg10[%c7_76, %c0_77], %259 {strides = array<i32>} : memref<8x32xf32, #tpu.memory_space<vmem>>, vector<1x32xf32>,
    %261 = vector.extract_strided_slice %258 {offsets = [0, 32], sizes = [1, 32], strides = [1, 1]} : vector<1x64xf32> to vector<1x32xf32>
    %c0_78 = arith.constant 0 : index
    %c0_79 = arith.constant 0 : index
    %262 = vector.load %arg11[%c0_78, %c0_79] : memref<8x32xf32, #tpu.memory_space<vmem>>, vector<1x32xf32>
    tpu.vector_store %arg11[%c0_78, %c0_79], %261 {strides = array<i32>} : memref<8x32xf32, #tpu.memory_space<vmem>>, vector<1x32xf32>,
    %c0_80 = arith.constant 0 : index
    %c0_81 = arith.constant 0 : index
    %263 = vector.load %arg10[%c0_80, %c0_81] : memref<8x32xf32, #tpu.memory_space<vmem>>, vector<8x32xf32>
    %c0_82 = arith.constant 0 : index
    %c0_83 = arith.constant 0 : index
    %264 = vector.load %arg4[%c0_82, %c0_83] : memref<64x256xf32, #tpu.memory_space<vmem>>, vector<32x256xf32>
    %cst_84 = arith.constant dense<0.000000e+00> : vector<8x256xf32>
    %265 = tpu.matmul %263, %264, %cst_84 {dimension_numbers = #tpu.dot_dimension_numbers<[1], [0], [0], [1], [0, 0, 1, 1], [], []>} : vector<8x32xf32>, vector<32x256xf32>, vector<8x256xf32> -> vector<8x256xf32>
    %c0_85 = arith.constant 0 : index
    %c0_86 = arith.constant 0 : index
    %266 = vector.load %arg11[%c0_85, %c0_86] : memref<8x32xf32, #tpu.memory_space<vmem>>, vector<8x32xf32>
    %c32 = arith.constant 32 : index
    %c0_87 = arith.constant 0 : index
    %267 = vector.load %arg4[%c32, %c0_87] : memref<64x256xf32, #tpu.memory_space<vmem>>, vector<32x256xf32>
    %cst_88 = arith.constant dense<0.000000e+00> : vector<8x256xf32>
    %268 = tpu.matmul %266, %267, %cst_88 {dimension_numbers = #tpu.dot_dimension_numbers<[1], [0], [0], [1], [0, 0, 1, 1], [], []>} : vector<8x32xf32>, vector<32x256xf32>, vector<8x256xf32> -> vector<8x256xf32>
    %269 = arith.addf %265, %268 : vector<8x256xf32>
    %c0_89 = arith.constant 0 : index
    %c0_90 = arith.constant 0 : index
    %270 = vector.load %arg6[%c0_89, %c0_90] : memref<1x256xf32, #tpu.memory_space<vmem>>, vector<1x256xf32>
    %271 = vector.broadcast %270 : vector<1x256xf32> to vector<8x256xf32>
    %272 = arith.addf %269, %271 : vector<8x256xf32>
    %c0_91 = arith.constant 0 : index
    %c0_92 = arith.constant 0 : index
    %273 = vector.load %arg12[%c0_91, %c0_92] : memref<8x256xf32, #tpu.memory_space<vmem>>, vector<8x256xf32>
    tpu.vector_store %arg12[%c0_91, %c0_92], %272 {strides = array<i32>} : memref<8x256xf32, #tpu.memory_space<vmem>>, vector<8x256xf32>,
    %cst_93 = arith.constant 0.000000e+00 : f32
    %274 = vector.broadcast %cst_93 : f32 to vector<1x64xf32>
    %cst_94 = arith.constant 0.000000e+00 : f32
    %275 = vector.broadcast %cst_94 : f32 to vector<1x64xf32>
    %c0_95 = arith.constant 0 : index
    %c0_96 = arith.constant 0 : index
    %276 = vector.load %arg12[%c0_95, %c0_96] : memref<8x256xf32, #tpu.memory_space<vmem>>, vector<1x256xf32>
    %c0_97 = arith.constant 0 : index
    %c0_98 = arith.constant 0 : index
    %277 = vector.load %arg5[%c0_97, %c0_98] : memref<64x256xf32, #tpu.memory_space<vmem>>, vector<64x256xf32>
    %cst_99 = arith.constant dense<0.000000e+00> : vector<1x256xf32>
    %278 = tpu.matmul %274, %277, %cst_99 {dimension_numbers = #tpu.dot_dimension_numbers<[1], [0], [0], [1], [0, 0, 1, 1], [], []>} : vector<1x64xf32>, vector<64x256xf32>, vector<1x256xf32> -> vector<1x256xf32>
    %279 = arith.addf %276, %278 : vector<1x256xf32>
    %280 = vector.extract_strided_slice %279 {offsets = [0, 0], sizes = [1, 64], strides = [1, 1]} : vector<1x256xf32> to vector<1x64xf32>
    %281 = arith.negf %280 : vector<1x64xf32>
    %282 = math.exp %281 : vector<1x64xf32>
    %cst_100 = arith.constant 1.000000e+00 : f32
    %283 = vector.broadcast %cst_100 : f32 to vector<1x64xf32>
    %284 = arith.addf %283, %282 : vector<1x64xf32>
    %285 = arith.divf %283, %284 : vector<1x64xf32>
    %286 = vector.extract_strided_slice %279 {offsets = [0, 64], sizes = [1, 64], strides = [1, 1]} : vector<1x256xf32> to vector<1x64xf32>
    %287 = arith.negf %286 : vector<1x64xf32>
    %288 = math.exp %287 : vector<1x64xf32>
    %cst_101 = arith.constant 1.000000e+00 : f32
    %289 = vector.broadcast %cst_101 : f32 to vector<1x64xf32>
    %290 = arith.addf %289, %288 : vector<1x64xf32>
    %291 = arith.divf %289, %290 : vector<1x64xf32>
    %292 = vector.extract_strided_slice %279 {offsets = [0, 128], sizes = [1, 64], strides = [1, 1]} : vector<1x256xf32> to vector<1x64xf32>
    %293 = math.tanh %292 : vector<1x64xf32>
    %294 = vector.extract_strided_slice %279 {offsets = [0, 192], sizes = [1, 64], strides = [1, 1]} : vector<1x256xf32> to vector<1x64xf32>
    %295 = arith.negf %294 : vector<1x64xf32>
    %296 = math.exp %295 : vector<1x64xf32>
    %cst_102 = arith.constant 1.000000e+00 : f32
    %297 = vector.broadcast %cst_102 : f32 to vector<1x64xf32>
    %298 = arith.addf %297, %296 : vector<1x64xf32>
    %299 = arith.divf %297, %298 : vector<1x64xf32>
    %300 = arith.mulf %291, %275 : vector<1x64xf32>
    %301 = arith.mulf %285, %293 : vector<1x64xf32>
    %302 = arith.addf %300, %301 : vector<1x64xf32>
    %303 = math.tanh %302 : vector<1x64xf32>
    %304 = arith.mulf %299, %303 : vector<1x64xf32>
    %c0_103 = arith.constant 0 : index
    %c0_104 = arith.constant 0 : index
    %305 = vector.load %arg13[%c0_103, %c0_104] : memref<8x64xf32, #tpu.memory_space<vmem>>, vector<1x64xf32>
    tpu.vector_store %arg13[%c0_103, %c0_104], %304 {strides = array<i32>} : memref<8x64xf32, #tpu.memory_space<vmem>>, vector<1x64xf32>,
    %c1_105 = arith.constant 1 : index
    %c0_106 = arith.constant 0 : index
    %306 = vector.load %arg12[%c1_105, %c0_106] : memref<8x256xf32, #tpu.memory_space<vmem>>, vector<1x256xf32>
    %c0_107 = arith.constant 0 : index
    %c0_108 = arith.constant 0 : index
    %307 = vector.load %arg5[%c0_107, %c0_108] : memref<64x256xf32, #tpu.memory_space<vmem>>, vector<64x256xf32>
    %cst_109 = arith.constant dense<0.000000e+00> : vector<1x256xf32>
    %308 = tpu.matmul %304, %307, %cst_109 {dimension_numbers = #tpu.dot_dimension_numbers<[1], [0], [0], [1], [0, 0, 1, 1], [], []>} : vector<1x64xf32>, vector<64x256xf32>, vector<1x256xf32> -> vector<1x256xf32>
    %309 = arith.addf %306, %308 : vector<1x256xf32>
    %310 = vector.extract_strided_slice %309 {offsets = [0, 0], sizes = [1, 64], strides = [1, 1]} : vector<1x256xf32> to vector<1x64xf32>
    %311 = arith.negf %310 : vector<1x64xf32>
    %312 = math.exp %311 : vector<1x64xf32>
    %cst_110 = arith.constant 1.000000e+00 : f32
    %313 = vector.broadcast %cst_110 : f32 to vector<1x64xf32>
    %314 = arith.addf %313, %312 : vector<1x64xf32>
    %315 = arith.divf %313, %314 : vector<1x64xf32>
    %316 = vector.extract_strided_slice %309 {offsets = [0, 64], sizes = [1, 64], strides = [1, 1]} : vector<1x256xf32> to vector<1x64xf32>
    %317 = arith.negf %316 : vector<1x64xf32>
    %318 = math.exp %317 : vector<1x64xf32>
    %cst_111 = arith.constant 1.000000e+00 : f32
    %319 = vector.broadcast %cst_111 : f32 to vector<1x64xf32>
    %320 = arith.addf %319, %318 : vector<1x64xf32>
    %321 = arith.divf %319, %320 : vector<1x64xf32>
    %322 = vector.extract_strided_slice %309 {offsets = [0, 128], sizes = [1, 64], strides = [1, 1]} : vector<1x256xf32> to vector<1x64xf32>
    %323 = math.tanh %322 : vector<1x64xf32>
    %324 = vector.extract_strided_slice %309 {offsets = [0, 192], sizes = [1, 64], strides = [1, 1]} : vector<1x256xf32> to vector<1x64xf32>
    %325 = arith.negf %324 : vector<1x64xf32>
    %326 = math.exp %325 : vector<1x64xf32>
    %cst_112 = arith.constant 1.000000e+00 : f32
    %327 = vector.broadcast %cst_112 : f32 to vector<1x64xf32>
    %328 = arith.addf %327, %326 : vector<1x64xf32>
    %329 = arith.divf %327, %328 : vector<1x64xf32>
    %330 = arith.mulf %321, %302 : vector<1x64xf32>
    %331 = arith.mulf %315, %323 : vector<1x64xf32>
    %332 = arith.addf %330, %331 : vector<1x64xf32>
    %333 = math.tanh %332 : vector<1x64xf32>
    %334 = arith.mulf %329, %333 : vector<1x64xf32>
    %c1_113 = arith.constant 1 : index
    %c0_114 = arith.constant 0 : index
    %335 = vector.load %arg13[%c1_113, %c0_114] : memref<8x64xf32, #tpu.memory_space<vmem>>, vector<1x64xf32>
    tpu.vector_store %arg13[%c1_113, %c0_114], %334 {strides = array<i32>} : memref<8x64xf32, #tpu.memory_space<vmem>>, vector<1x64xf32>,
    %c2_115 = arith.constant 2 : index
    %c0_116 = arith.constant 0 : index
    %336 = vector.load %arg12[%c2_115, %c0_116] : memref<8x256xf32, #tpu.memory_space<vmem>>, vector<1x256xf32>
    %c0_117 = arith.constant 0 : index
    %c0_118 = arith.constant 0 : index
    %337 = vector.load %arg5[%c0_117, %c0_118] : memref<64x256xf32, #tpu.memory_space<vmem>>, vector<64x256xf32>
    %cst_119 = arith.constant dense<0.000000e+00> : vector<1x256xf32>
    %338 = tpu.matmul %334, %337, %cst_119 {dimension_numbers = #tpu.dot_dimension_numbers<[1], [0], [0], [1], [0, 0, 1, 1], [], []>} : vector<1x64xf32>, vector<64x256xf32>, vector<1x256xf32> -> vector<1x256xf32>
    %339 = arith.addf %336, %338 : vector<1x256xf32>
    %340 = vector.extract_strided_slice %339 {offsets = [0, 0], sizes = [1, 64], strides = [1, 1]} : vector<1x256xf32> to vector<1x64xf32>
    %341 = arith.negf %340 : vector<1x64xf32>
    %342 = math.exp %341 : vector<1x64xf32>
    %cst_120 = arith.constant 1.000000e+00 : f32
    %343 = vector.broadcast %cst_120 : f32 to vector<1x64xf32>
    %344 = arith.addf %343, %342 : vector<1x64xf32>
    %345 = arith.divf %343, %344 : vector<1x64xf32>
    %346 = vector.extract_strided_slice %339 {offsets = [0, 64], sizes = [1, 64], strides = [1, 1]} : vector<1x256xf32> to vector<1x64xf32>
    %347 = arith.negf %346 : vector<1x64xf32>
    %348 = math.exp %347 : vector<1x64xf32>
    %cst_121 = arith.constant 1.000000e+00 : f32
    %349 = vector.broadcast %cst_121 : f32 to vector<1x64xf32>
    %350 = arith.addf %349, %348 : vector<1x64xf32>
    %351 = arith.divf %349, %350 : vector<1x64xf32>
    %352 = vector.extract_strided_slice %339 {offsets = [0, 128], sizes = [1, 64], strides = [1, 1]} : vector<1x256xf32> to vector<1x64xf32>
    %353 = math.tanh %352 : vector<1x64xf32>
    %354 = vector.extract_strided_slice %339 {offsets = [0, 192], sizes = [1, 64], strides = [1, 1]} : vector<1x256xf32> to vector<1x64xf32>
    %355 = arith.negf %354 : vector<1x64xf32>
    %356 = math.exp %355 : vector<1x64xf32>
    %cst_122 = arith.constant 1.000000e+00 : f32
    %357 = vector.broadcast %cst_122 : f32 to vector<1x64xf32>
    %358 = arith.addf %357, %356 : vector<1x64xf32>
    %359 = arith.divf %357, %358 : vector<1x64xf32>
    %360 = arith.mulf %351, %332 : vector<1x64xf32>
    %361 = arith.mulf %345, %353 : vector<1x64xf32>
    %362 = arith.addf %360, %361 : vector<1x64xf32>
    %363 = math.tanh %362 : vector<1x64xf32>
    %364 = arith.mulf %359, %363 : vector<1x64xf32>
    %c2_123 = arith.constant 2 : index
    %c0_124 = arith.constant 0 : index
    %365 = vector.load %arg13[%c2_123, %c0_124] : memref<8x64xf32, #tpu.memory_space<vmem>>, vector<1x64xf32>
    tpu.vector_store %arg13[%c2_123, %c0_124], %364 {strides = array<i32>} : memref<8x64xf32, #tpu.memory_space<vmem>>, vector<1x64xf32>,
    %c3_125 = arith.constant 3 : index
    %c0_126 = arith.constant 0 : index
    %366 = vector.load %arg12[%c3_125, %c0_126] : memref<8x256xf32, #tpu.memory_space<vmem>>, vector<1x256xf32>
    %c0_127 = arith.constant 0 : index
    %c0_128 = arith.constant 0 : index
    %367 = vector.load %arg5[%c0_127, %c0_128] : memref<64x256xf32, #tpu.memory_space<vmem>>, vector<64x256xf32>
    %cst_129 = arith.constant dense<0.000000e+00> : vector<1x256xf32>
    %368 = tpu.matmul %364, %367, %cst_129 {dimension_numbers = #tpu.dot_dimension_numbers<[1], [0], [0], [1], [0, 0, 1, 1], [], []>} : vector<1x64xf32>, vector<64x256xf32>, vector<1x256xf32> -> vector<1x256xf32>
    %369 = arith.addf %366, %368 : vector<1x256xf32>
    %370 = vector.extract_strided_slice %369 {offsets = [0, 0], sizes = [1, 64], strides = [1, 1]} : vector<1x256xf32> to vector<1x64xf32>
    %371 = arith.negf %370 : vector<1x64xf32>
    %372 = math.exp %371 : vector<1x64xf32>
    %cst_130 = arith.constant 1.000000e+00 : f32
    %373 = vector.broadcast %cst_130 : f32 to vector<1x64xf32>
    %374 = arith.addf %373, %372 : vector<1x64xf32>
    %375 = arith.divf %373, %374 : vector<1x64xf32>
    %376 = vector.extract_strided_slice %369 {offsets = [0, 64], sizes = [1, 64], strides = [1, 1]} : vector<1x256xf32> to vector<1x64xf32>
    %377 = arith.negf %376 : vector<1x64xf32>
    %378 = math.exp %377 : vector<1x64xf32>
    %cst_131 = arith.constant 1.000000e+00 : f32
    %379 = vector.broadcast %cst_131 : f32 to vector<1x64xf32>
    %380 = arith.addf %379, %378 : vector<1x64xf32>
    %381 = arith.divf %379, %380 : vector<1x64xf32>
    %382 = vector.extract_strided_slice %369 {offsets = [0, 128], sizes = [1, 64], strides = [1, 1]} : vector<1x256xf32> to vector<1x64xf32>
    %383 = math.tanh %382 : vector<1x64xf32>
    %384 = vector.extract_strided_slice %369 {offsets = [0, 192], sizes = [1, 64], strides = [1, 1]} : vector<1x256xf32> to vector<1x64xf32>
    %385 = arith.negf %384 : vector<1x64xf32>
    %386 = math.exp %385 : vector<1x64xf32>
    %cst_132 = arith.constant 1.000000e+00 : f32
    %387 = vector.broadcast %cst_132 : f32 to vector<1x64xf32>
    %388 = arith.addf %387, %386 : vector<1x64xf32>
    %389 = arith.divf %387, %388 : vector<1x64xf32>
    %390 = arith.mulf %381, %362 : vector<1x64xf32>
    %391 = arith.mulf %375, %383 : vector<1x64xf32>
    %392 = arith.addf %390, %391 : vector<1x64xf32>
    %393 = math.tanh %392 : vector<1x64xf32>
    %394 = arith.mulf %389, %393 : vector<1x64xf32>
    %c3_133 = arith.constant 3 : index
    %c0_134 = arith.constant 0 : index
    %395 = vector.load %arg13[%c3_133, %c0_134] : memref<8x64xf32, #tpu.memory_space<vmem>>, vector<1x64xf32>
    tpu.vector_store %arg13[%c3_133, %c0_134], %394 {strides = array<i32>} : memref<8x64xf32, #tpu.memory_space<vmem>>, vector<1x64xf32>,
    %c4_135 = arith.constant 4 : index
    %c0_136 = arith.constant 0 : index
    %396 = vector.load %arg12[%c4_135, %c0_136] : memref<8x256xf32, #tpu.memory_space<vmem>>, vector<1x256xf32>
    %c0_137 = arith.constant 0 : index
    %c0_138 = arith.constant 0 : index
    %397 = vector.load %arg5[%c0_137, %c0_138] : memref<64x256xf32, #tpu.memory_space<vmem>>, vector<64x256xf32>
    %cst_139 = arith.constant dense<0.000000e+00> : vector<1x256xf32>
    %398 = tpu.matmul %394, %397, %cst_139 {dimension_numbers = #tpu.dot_dimension_numbers<[1], [0], [0], [1], [0, 0, 1, 1], [], []>} : vector<1x64xf32>, vector<64x256xf32>, vector<1x256xf32> -> vector<1x256xf32>
    %399 = arith.addf %396, %398 : vector<1x256xf32>
    %400 = vector.extract_strided_slice %399 {offsets = [0, 0], sizes = [1, 64], strides = [1, 1]} : vector<1x256xf32> to vector<1x64xf32>
    %401 = arith.negf %400 : vector<1x64xf32>
    %402 = math.exp %401 : vector<1x64xf32>
    %cst_140 = arith.constant 1.000000e+00 : f32
    %403 = vector.broadcast %cst_140 : f32 to vector<1x64xf32>
    %404 = arith.addf %403, %402 : vector<1x64xf32>
    %405 = arith.divf %403, %404 : vector<1x64xf32>
    %406 = vector.extract_strided_slice %399 {offsets = [0, 64], sizes = [1, 64], strides = [1, 1]} : vector<1x256xf32> to vector<1x64xf32>
    %407 = arith.negf %406 : vector<1x64xf32>
    %408 = math.exp %407 : vector<1x64xf32>
    %cst_141 = arith.constant 1.000000e+00 : f32
    %409 = vector.broadcast %cst_141 : f32 to vector<1x64xf32>
    %410 = arith.addf %409, %408 : vector<1x64xf32>
    %411 = arith.divf %409, %410 : vector<1x64xf32>
    %412 = vector.extract_strided_slice %399 {offsets = [0, 128], sizes = [1, 64], strides = [1, 1]} : vector<1x256xf32> to vector<1x64xf32>
    %413 = math.tanh %412 : vector<1x64xf32>
    %414 = vector.extract_strided_slice %399 {offsets = [0, 192], sizes = [1, 64], strides = [1, 1]} : vector<1x256xf32> to vector<1x64xf32>
    %415 = arith.negf %414 : vector<1x64xf32>
    %416 = math.exp %415 : vector<1x64xf32>
    %cst_142 = arith.constant 1.000000e+00 : f32
    %417 = vector.broadcast %cst_142 : f32 to vector<1x64xf32>
    %418 = arith.addf %417, %416 : vector<1x64xf32>
    %419 = arith.divf %417, %418 : vector<1x64xf32>
    %420 = arith.mulf %411, %392 : vector<1x64xf32>
    %421 = arith.mulf %405, %413 : vector<1x64xf32>
    %422 = arith.addf %420, %421 : vector<1x64xf32>
    %423 = math.tanh %422 : vector<1x64xf32>
    %424 = arith.mulf %419, %423 : vector<1x64xf32>
    %c4_143 = arith.constant 4 : index
    %c0_144 = arith.constant 0 : index
    %425 = vector.load %arg13[%c4_143, %c0_144] : memref<8x64xf32, #tpu.memory_space<vmem>>, vector<1x64xf32>
    tpu.vector_store %arg13[%c4_143, %c0_144], %424 {strides = array<i32>} : memref<8x64xf32, #tpu.memory_space<vmem>>, vector<1x64xf32>,
    %c5_145 = arith.constant 5 : index
    %c0_146 = arith.constant 0 : index
    %426 = vector.load %arg12[%c5_145, %c0_146] : memref<8x256xf32, #tpu.memory_space<vmem>>, vector<1x256xf32>
    %c0_147 = arith.constant 0 : index
    %c0_148 = arith.constant 0 : index
    %427 = vector.load %arg5[%c0_147, %c0_148] : memref<64x256xf32, #tpu.memory_space<vmem>>, vector<64x256xf32>
    %cst_149 = arith.constant dense<0.000000e+00> : vector<1x256xf32>
    %428 = tpu.matmul %424, %427, %cst_149 {dimension_numbers = #tpu.dot_dimension_numbers<[1], [0], [0], [1], [0, 0, 1, 1], [], []>} : vector<1x64xf32>, vector<64x256xf32>, vector<1x256xf32> -> vector<1x256xf32>
    %429 = arith.addf %426, %428 : vector<1x256xf32>
    %430 = vector.extract_strided_slice %429 {offsets = [0, 0], sizes = [1, 64], strides = [1, 1]} : vector<1x256xf32> to vector<1x64xf32>
    %431 = arith.negf %430 : vector<1x64xf32>
    %432 = math.exp %431 : vector<1x64xf32>
    %cst_150 = arith.constant 1.000000e+00 : f32
    %433 = vector.broadcast %cst_150 : f32 to vector<1x64xf32>
    %434 = arith.addf %433, %432 : vector<1x64xf32>
    %435 = arith.divf %433, %434 : vector<1x64xf32>
    %436 = vector.extract_strided_slice %429 {offsets = [0, 64], sizes = [1, 64], strides = [1, 1]} : vector<1x256xf32> to vector<1x64xf32>
    %437 = arith.negf %436 : vector<1x64xf32>
    %438 = math.exp %437 : vector<1x64xf32>
    %cst_151 = arith.constant 1.000000e+00 : f32
    %439 = vector.broadcast %cst_151 : f32 to vector<1x64xf32>
    %440 = arith.addf %439, %438 : vector<1x64xf32>
    %441 = arith.divf %439, %440 : vector<1x64xf32>
    %442 = vector.extract_strided_slice %429 {offsets = [0, 128], sizes = [1, 64], strides = [1, 1]} : vector<1x256xf32> to vector<1x64xf32>
    %443 = math.tanh %442 : vector<1x64xf32>
    %444 = vector.extract_strided_slice %429 {offsets = [0, 192], sizes = [1, 64], strides = [1, 1]} : vector<1x256xf32> to vector<1x64xf32>
    %445 = arith.negf %444 : vector<1x64xf32>
    %446 = math.exp %445 : vector<1x64xf32>
    %cst_152 = arith.constant 1.000000e+00 : f32
    %447 = vector.broadcast %cst_152 : f32 to vector<1x64xf32>
    %448 = arith.addf %447, %446 : vector<1x64xf32>
    %449 = arith.divf %447, %448 : vector<1x64xf32>
    %450 = arith.mulf %441, %422 : vector<1x64xf32>
    %451 = arith.mulf %435, %443 : vector<1x64xf32>
    %452 = arith.addf %450, %451 : vector<1x64xf32>
    %453 = math.tanh %452 : vector<1x64xf32>
    %454 = arith.mulf %449, %453 : vector<1x64xf32>
    %c5_153 = arith.constant 5 : index
    %c0_154 = arith.constant 0 : index
    %455 = vector.load %arg13[%c5_153, %c0_154] : memref<8x64xf32, #tpu.memory_space<vmem>>, vector<1x64xf32>
    tpu.vector_store %arg13[%c5_153, %c0_154], %454 {strides = array<i32>} : memref<8x64xf32, #tpu.memory_space<vmem>>, vector<1x64xf32>,
    %c6_155 = arith.constant 6 : index
    %c0_156 = arith.constant 0 : index
    %456 = vector.load %arg12[%c6_155, %c0_156] : memref<8x256xf32, #tpu.memory_space<vmem>>, vector<1x256xf32>
    %c0_157 = arith.constant 0 : index
    %c0_158 = arith.constant 0 : index
    %457 = vector.load %arg5[%c0_157, %c0_158] : memref<64x256xf32, #tpu.memory_space<vmem>>, vector<64x256xf32>
    %cst_159 = arith.constant dense<0.000000e+00> : vector<1x256xf32>
    %458 = tpu.matmul %454, %457, %cst_159 {dimension_numbers = #tpu.dot_dimension_numbers<[1], [0], [0], [1], [0, 0, 1, 1], [], []>} : vector<1x64xf32>, vector<64x256xf32>, vector<1x256xf32> -> vector<1x256xf32>
    %459 = arith.addf %456, %458 : vector<1x256xf32>
    %460 = vector.extract_strided_slice %459 {offsets = [0, 0], sizes = [1, 64], strides = [1, 1]} : vector<1x256xf32> to vector<1x64xf32>
    %461 = arith.negf %460 : vector<1x64xf32>
    %462 = math.exp %461 : vector<1x64xf32>
    %cst_160 = arith.constant 1.000000e+00 : f32
    %463 = vector.broadcast %cst_160 : f32 to vector<1x64xf32>
    %464 = arith.addf %463, %462 : vector<1x64xf32>
    %465 = arith.divf %463, %464 : vector<1x64xf32>
    %466 = vector.extract_strided_slice %459 {offsets = [0, 64], sizes = [1, 64], strides = [1, 1]} : vector<1x256xf32> to vector<1x64xf32>
    %467 = arith.negf %466 : vector<1x64xf32>
    %468 = math.exp %467 : vector<1x64xf32>
    %cst_161 = arith.constant 1.000000e+00 : f32
    %469 = vector.broadcast %cst_161 : f32 to vector<1x64xf32>
    %470 = arith.addf %469, %468 : vector<1x64xf32>
    %471 = arith.divf %469, %470 : vector<1x64xf32>
    %472 = vector.extract_strided_slice %459 {offsets = [0, 128], sizes = [1, 64], strides = [1, 1]} : vector<1x256xf32> to vector<1x64xf32>
    %473 = math.tanh %472 : vector<1x64xf32>
    %474 = vector.extract_strided_slice %459 {offsets = [0, 192], sizes = [1, 64], strides = [1, 1]} : vector<1x256xf32> to vector<1x64xf32>
    %475 = arith.negf %474 : vector<1x64xf32>
    %476 = math.exp %475 : vector<1x64xf32>
    %cst_162 = arith.constant 1.000000e+00 : f32
    %477 = vector.broadcast %cst_162 : f32 to vector<1x64xf32>
    %478 = arith.addf %477, %476 : vector<1x64xf32>
    %479 = arith.divf %477, %478 : vector<1x64xf32>
    %480 = arith.mulf %471, %452 : vector<1x64xf32>
    %481 = arith.mulf %465, %473 : vector<1x64xf32>
    %482 = arith.addf %480, %481 : vector<1x64xf32>
    %483 = math.tanh %482 : vector<1x64xf32>
    %484 = arith.mulf %479, %483 : vector<1x64xf32>
    %c6_163 = arith.constant 6 : index
    %c0_164 = arith.constant 0 : index
    %485 = vector.load %arg13[%c6_163, %c0_164] : memref<8x64xf32, #tpu.memory_space<vmem>>, vector<1x64xf32>
    tpu.vector_store %arg13[%c6_163, %c0_164], %484 {strides = array<i32>} : memref<8x64xf32, #tpu.memory_space<vmem>>, vector<1x64xf32>,
    %c7_165 = arith.constant 7 : index
    %c0_166 = arith.constant 0 : index
    %486 = vector.load %arg12[%c7_165, %c0_166] : memref<8x256xf32, #tpu.memory_space<vmem>>, vector<1x256xf32>
    %c0_167 = arith.constant 0 : index
    %c0_168 = arith.constant 0 : index
    %487 = vector.load %arg5[%c0_167, %c0_168] : memref<64x256xf32, #tpu.memory_space<vmem>>, vector<64x256xf32>
    %cst_169 = arith.constant dense<0.000000e+00> : vector<1x256xf32>
    %488 = tpu.matmul %484, %487, %cst_169 {dimension_numbers = #tpu.dot_dimension_numbers<[1], [0], [0], [1], [0, 0, 1, 1], [], []>} : vector<1x64xf32>, vector<64x256xf32>, vector<1x256xf32> -> vector<1x256xf32>
    %489 = arith.addf %486, %488 : vector<1x256xf32>
    %490 = vector.extract_strided_slice %489 {offsets = [0, 0], sizes = [1, 64], strides = [1, 1]} : vector<1x256xf32> to vector<1x64xf32>
    %491 = arith.negf %490 : vector<1x64xf32>
    %492 = math.exp %491 : vector<1x64xf32>
    %cst_170 = arith.constant 1.000000e+00 : f32
    %493 = vector.broadcast %cst_170 : f32 to vector<1x64xf32>
    %494 = arith.addf %493, %492 : vector<1x64xf32>
    %495 = arith.divf %493, %494 : vector<1x64xf32>
    %496 = vector.extract_strided_slice %489 {offsets = [0, 64], sizes = [1, 64], strides = [1, 1]} : vector<1x256xf32> to vector<1x64xf32>
    %497 = arith.negf %496 : vector<1x64xf32>
    %498 = math.exp %497 : vector<1x64xf32>
    %cst_171 = arith.constant 1.000000e+00 : f32
    %499 = vector.broadcast %cst_171 : f32 to vector<1x64xf32>
    %500 = arith.addf %499, %498 : vector<1x64xf32>
    %501 = arith.divf %499, %500 : vector<1x64xf32>
    %502 = vector.extract_strided_slice %489 {offsets = [0, 128], sizes = [1, 64], strides = [1, 1]} : vector<1x256xf32> to vector<1x64xf32>
    %503 = math.tanh %502 : vector<1x64xf32>
    %504 = vector.extract_strided_slice %489 {offsets = [0, 192], sizes = [1, 64], strides = [1, 1]} : vector<1x256xf32> to vector<1x64xf32>
    %505 = arith.negf %504 : vector<1x64xf32>
    %506 = math.exp %505 : vector<1x64xf32>
    %cst_172 = arith.constant 1.000000e+00 : f32
    %507 = vector.broadcast %cst_172 : f32 to vector<1x64xf32>
    %508 = arith.addf %507, %506 : vector<1x64xf32>
    %509 = arith.divf %507, %508 : vector<1x64xf32>
    %510 = arith.mulf %501, %482 : vector<1x64xf32>
    %511 = arith.mulf %495, %503 : vector<1x64xf32>
    %512 = arith.addf %510, %511 : vector<1x64xf32>
    %513 = math.tanh %512 : vector<1x64xf32>
    %514 = arith.mulf %509, %513 : vector<1x64xf32>
    %c7_173 = arith.constant 7 : index
    %c0_174 = arith.constant 0 : index
    %515 = vector.load %arg13[%c7_173, %c0_174] : memref<8x64xf32, #tpu.memory_space<vmem>>, vector<1x64xf32>
    tpu.vector_store %arg13[%c7_173, %c0_174], %514 {strides = array<i32>} : memref<8x64xf32, #tpu.memory_space<vmem>>, vector<1x64xf32>,
    %c0_175 = arith.constant 0 : index
    %c0_176 = arith.constant 0 : index
    %516 = vector.load %arg13[%c0_175, %c0_176] : memref<8x64xf32, #tpu.memory_space<vmem>>, vector<8x64xf32>
    %c0_177 = arith.constant 0 : index
    %c0_178 = arith.constant 0 : index
    %517 = vector.load %arg7[%c0_177, %c0_178] : memref<64x128xf32, #tpu.memory_space<vmem>>, vector<64x128xf32>
    %cst_179 = arith.constant dense<0.000000e+00> : vector<8x128xf32>
    %518 = tpu.matmul %516, %517, %cst_179 {dimension_numbers = #tpu.dot_dimension_numbers<[1], [0], [0], [1], [0, 0, 1, 1], [], []>} : vector<8x64xf32>, vector<64x128xf32>, vector<8x128xf32> -> vector<8x128xf32>
    %c0_180 = arith.constant 0 : index
    %c0_181 = arith.constant 0 : index
    %519 = vector.load %arg8[%c0_180, %c0_181] : memref<1x128xf32, #tpu.memory_space<vmem>>, vector<1x128xf32>
    %520 = vector.broadcast %519 : vector<1x128xf32> to vector<8x128xf32>
    %521 = arith.addf %518, %520 : vector<8x128xf32>
    %c0_182 = arith.constant 0 : index
    %c0_183 = arith.constant 0 : index
    %522 = vector.load %arg9[%c0_182, %c0_183] : memref<8x128xf32, #tpu.memory_space<vmem>>, vector<8x128xf32>
    tpu.vector_store %arg9[%c0_182, %c0_183], %521 {strides = array<i32>} : memref<8x128xf32, #tpu.memory_space<vmem>>, vector<8x128xf32>,
    return
  }
}

</mosaic_0001>

<bundles_post_ra>
// kernel: tpu_custom_call.1
= control target key start
LH: loop header
LB: loop body
LE: loop exit
PB: predicated region body
PF: predicated region fallthrough
CT: control target
= control target key end

     0   :  { %14 = vsyncpa [#allocation7], 0  ;;  %s3900_s0 = inlined_call_operand.hbm [shape: f32[1,32], index: 0, kind: input, shape index: {}]   ;;  %s3901_s1 = inlined_call_operand.hbm [shape: f32[32,256], index: 1, kind: input, shape index: {}]   ;;  %s3902_s2 = inlined_call_operand.hbm [shape: f32[64,256], index: 2, kind: input, shape index: {}]   ;;  %s3903_s3 = inlined_call_operand.vmem [shape: f32[1,256], index: 3, kind: input, shape index: {}]   ;;  %s3904_s4 = inlined_call_operand.hbm [shape: f32[64,256], index: 4, kind: input, shape index: {}]   ;;  %s3905_s5 = inlined_call_operand.hbm [shape: f32[64,256], index: 5, kind: input, shape index: {}]   ;;  %s3906_s6 = inlined_call_operand.vmem [shape: f32[1,256], index: 6, kind: input, shape index: {}]   ;;  %s3907_s7 = inlined_call_operand.hbm [shape: f32[64,128], index: 7, kind: input, shape index: {}]   ;;  %s3908_s8 = inlined_call_operand.vmem [shape: f32[1,128], index: 8, kind: input, shape index: {}]   ;;  %s3909_s9 = inlined_call_operand.hbm [shape: f32[8,128], index: 9, kind: output, shape index: {}]  }
   0x1   :  { %15 = vsyncpa [#allocation10], 0 }
   0x2   :  { %16 = vsyncpa [#allocation13], 0 }
   0x3   :  { %17 = vsyncpa [#allocation16], 0 }
   0x4   :  { %18 = vsyncpa [#allocation8], 0  ;;  %s3381_s30 = smov [#allocation9]   ;;  %s3217_s13 = scalar_lea.hbm %s3901_s1, 1024 }
   0x5   :  { %s34_s10 = sshll.u32 %s3381_s30, 4  ;;  %p3218_p0 = scmp.ne.s32.totalorder %s3901_s1, %s3217_s13  ;;  %s35_s10 = int_to_ptr.vmem [resolvable:$true] %s34_s10 }
   0x6   :  { %p3221_p1 = scmp.lt.u32.totalorder %s3217_s13, %s3901_s1 }
   0x8   :  { %p3223_p2 = pnand %p3221_p1, %p3218_p0 }
   0xa   :  { %3226 = shalt.err (!%p3223_p2)
}
   0xb   :  { %s3227_s18 = scalar_lea.vmem %s35_s10, 1024  ;;  %p3232_p4 = scmp.lt.s32.totalorder %s35_s10, %s35_s10 }
   0xc   :  { %p3228_p3 = scmp.ne.s32.totalorder %s35_s10, %s3227_s18  ;;  %p3233_p5 = scmp.lt.s32.totalorder %s3227_s18, %s3227_s18 }
   0xe   :  { %p3234_p6 = por %p3233_p5, %p3232_p4 }
  0x10   :  { %p3235_p7 = pnand %p3234_p6, %p3228_p3 }
  0x12   :  { %3238 = shalt.err (!%p3235_p7)
}
  0x13   :  { %s3382_s19 = smov 256   ;;  %s3383_s20 = smov 16  }
  0x14   :  { %40 = dma.hbm_to_vmem [thread:$0]  %s3901_s1, 1024, %s35_s10, [#allocation10], %s3382_s19, %s3382_s19, %s3383_s20  }
  0x15   :  { %s3384_s23 = smov [#allocation12]   ;;  %s3385_s25 = smov [#allocation6]  }
  0x16   :  { %s60_s24 = sshll.u32 %s3384_s23, 4  ;;  %s25_s26 = sshll.u32 %s3385_s25, 4  ;;  %s61_s24 = int_to_ptr.vmem [resolvable:$true] %s60_s24  ;;  %s26_s26 = int_to_ptr.vmem [resolvable:$true] %s25_s26 }
  0x17   :  { %s3239_s29 = scalar_lea.hbm %s3904_s4, 2048 }
  0x18   :  { %p3240_p8 = scmp.ne.s32.totalorder %s3904_s4, %s3239_s29  ;;  %p3243_p9 = scmp.lt.u32.totalorder %s3239_s29, %s3904_s4 }
  0x1a   :  { %p3245_p10 = pnand %p3243_p9, %p3240_p8 }
  0x1c   :  { %3248 = shalt.err (!%p3245_p10)
}
  0x1d   :  { %s3249_s1 = scalar_lea.vmem %s61_s24, 2048  ;;  %p3254_p12 = scmp.lt.s32.totalorder %s61_s24, %s61_s24 }
  0x1e   :  { %p3250_p11 = scmp.ne.s32.totalorder %s61_s24, %s3249_s1  ;;  %p3255_p13 = scmp.lt.s32.totalorder %s3249_s1, %s3249_s1 }
  0x20   :  { %p3256_p0 = por %p3255_p13, %p3254_p12 }
  0x22   :  { %p3257_p1 = pnand %p3256_p0, %p3250_p11 }
  0x24   :  { %3260 = shalt.err (!%p3257_p1)
}
  0x25   :  { %66 = dma.hbm_to_vmem [thread:$0]  %s3904_s4, 2048, %s61_s24, [#allocation13], %s3382_s19, %s3382_s19, %s3383_s20  }
  0x26   :  { %s3261_s17 = scalar_lea.hbm %s3900_s0, 16 }
  0x27   :  { %p3262_p2 = scmp.ne.s32.totalorder %s3900_s0, %s3261_s17  ;;  %p3265_p3 = scmp.lt.u32.totalorder %s3261_s17, %s3900_s0 }
  0x29   :  { %p3267_p4 = pnand %p3265_p3, %p3262_p2 }
  0x2b   :  { %3270 = shalt.err (!%p3267_p4)
}
  0x2c   :  { %s3271_s25 = scalar_lea.vmem %s26_s26, 16  ;;  %s3275_s27 = scalar_lea.vmem %s26_s26, 32 }
  0x2d   :  { %p3272_p5 = scmp.ne.s32.totalorder %s26_s26, %s3271_s25  ;;  %p3276_p6 = scmp.lt.s32.totalorder %s26_s26, %s26_s26 }
  0x2e   :  { %p3277_p7 = scmp.lt.s32.totalorder %s3275_s27, %s3271_s25 }
  0x30   :  { %p3278_p8 = por %p3277_p7, %p3276_p6 }
  0x32   :  { %p3279_p9 = pnand %p3278_p8, %p3272_p5 }
  0x34   :  { %3282 = shalt.err (!%p3279_p9)
}
  0x35   :  { %28 = dma.hbm_to_vmem [thread:$0]  %s3900_s0, 16, %s26_s26, [#allocation7]  }
  0x36   :  { %s3386_s28 = smov [#allocation11]   ;;  %s3387_s30 = smov [#allocation14]  }
  0x37   :  { %s46_s29 = sshll.u32 %s3386_s28, 4  ;;  %s72_s11 = sshll.u32 %s3387_s30, 4  ;;  %s47_s29 = int_to_ptr.vmem [resolvable:$true] %s46_s29  ;;  %s73_s11 = int_to_ptr.vmem [resolvable:$true] %s72_s11 }
  0x38   :  { %s3283_s1 = scalar_lea.hbm %s3902_s2, 2048 }
  0x39   :  { %p3284_p10 = scmp.ne.s32.totalorder %s3902_s2, %s3283_s1  ;;  %p3287_p11 = scmp.lt.u32.totalorder %s3283_s1, %s3902_s2 }
  0x3b   :  { %p3289_p12 = pnand %p3287_p11, %p3284_p10 }
  0x3d   :  { %3292 = shalt.err (!%p3289_p12)
}
  0x3e   :  { %s3293_s0 = scalar_lea.vmem %s47_s29, 2048  ;;  %p3298_p0 = scmp.lt.s32.totalorder %s47_s29, %s47_s29 }
  0x3f   :  { %p3294_p13 = scmp.ne.s32.totalorder %s47_s29, %s3293_s0  ;;  %p3299_p1 = scmp.lt.s32.totalorder %s3293_s0, %s3293_s0 }
  0x41   :  { %p3300_p2 = por %p3299_p1, %p3298_p0 }
  0x43   :  { %p3301_p3 = pnand %p3300_p2, %p3294_p13 }
  0x45   :  { %3304 = shalt.err (!%p3301_p3)
}
  0x46   :  { %52 = dma.hbm_to_vmem [thread:$0]  %s3902_s2, 2048, %s47_s29, [#allocation10], %s3382_s19, %s3382_s19, %s3383_s20  }
  0x47   :  { %s3305_s22 = scalar_lea.hbm %s3905_s5, 2048 }
  0x48   :  { %p3306_p4 = scmp.ne.s32.totalorder %s3905_s5, %s3305_s22  ;;  %p3309_p5 = scmp.lt.u32.totalorder %s3305_s22, %s3905_s5 }
  0x4a   :  { %p3311_p6 = pnand %p3309_p5, %p3306_p4 }
  0x4c   :  { %3314 = shalt.err (!%p3311_p6)
}
  0x4d   :  { %s3315_s24 = scalar_lea.vmem %s73_s11, 2048  ;;  %p3320_p8 = scmp.lt.s32.totalorder %s73_s11, %s73_s11 }
  0x4e   :  { %p3316_p7 = scmp.ne.s32.totalorder %s73_s11, %s3315_s24  ;;  %p3321_p9 = scmp.lt.s32.totalorder %s3315_s24, %s3315_s24 }
  0x50   :  { %p3322_p10 = por %p3321_p9, %p3320_p8 }
  0x52   :  { %p3323_p11 = pnand %p3322_p10, %p3316_p7 }
  0x54   :  { %3326 = shalt.err (!%p3323_p11)
}
  0x55   :  { %78 = dma.hbm_to_vmem [thread:$0]  %s3905_s5, 2048, %s73_s11, [#allocation13], %s3382_s19, %s3382_s19, %s3383_s20  }
  0x56   :  { %s3388_s29 = smov [#allocation15]   ;;  %s3327_s1 = scalar_lea.hbm %s3907_s7, 1024 }
  0x57   :  { %s86_s30 = sshll.u32 %s3388_s29, 4  ;;  %p3328_p12 = scmp.ne.s32.totalorder %s3907_s7, %s3327_s1  ;;  %s87_s30 = int_to_ptr.vmem [resolvable:$true] %s86_s30 }
  0x58   :  { %p3331_p13 = scmp.lt.u32.totalorder %s3327_s1, %s3907_s7 }
  0x5a   :  { %p3333_p0 = pnand %p3331_p13, %p3328_p12 }
  0x5c   :  { %3336 = shalt.err (!%p3333_p0)
}
  0x5d   :  { %s3337_s0 = scalar_lea.vmem %s87_s30, 1024  ;;  %p3342_p2 = scmp.lt.s32.totalorder %s87_s30, %s87_s30 }
  0x5e   :  { %p3338_p1 = scmp.ne.s32.totalorder %s87_s30, %s3337_s0  ;;  %p3343_p3 = scmp.lt.s32.totalorder %s3337_s0, %s3337_s0 }
  0x60   :  { %p3344_p4 = por %p3343_p3, %p3342_p2 }
  0x62   :  { %p3345_p5 = pnand %p3344_p4, %p3338_p1 }
  0x64   :  { %3348 = shalt.err (!%p3345_p5)
}
  0x65   :  { %s3389_s5 = smov 128   ;;  %s3390_s19 = smov 8  }
  0x66   :  { %92 = dma.hbm_to_vmem [thread:$0]  %s3907_s7, 1024, %s87_s30, [#allocation16], %s3389_s5, %s3389_s5, %s3390_s19  }
  0x67   :  { %3371 = dma.done.wait [#allocation7], 16  }
  0x68   :  { %3372 = vsyncadd [#allocation7], 4294967280 }
  0x69   :  { %3373 = dma.done.wait [#allocation10], 3072  }
  0x6a   :  { %3374 = vsyncadd [#allocation10], 4294964224 }
  0x6b   :  { %3375 = dma.done.wait [#allocation13], 4096  }
  0x6c   :  { %3376 = vsyncadd [#allocation13], 4294963200 }
  0x6d   :  { %3377 = dma.done.wait [#allocation16], 1024  }
  0x6e   :  { %3378 = vsyncadd [#allocation16], 4294966272  ;;  %v3391_v0 = vmov 0.0   ;;  %v210_v1 = vld [vmem:[#allocation11 + $0x8] sm:$0xff]  ;;  %v212_v2 = vld [vmem:[#allocation11 + $0x18] sm:$0xff]  ;;  %vm134_vm0 = vcmask 261120   ;;  %v124_v38 = vlaneseq }
  0x6f   :  { %202 = vmatprep.mubr.f32.mxu0 %v3391_v0  ;;  %293 = vmatprep.mubr.f32.mxu1 %v3391_v0  ;;  %v209_v3 = vld [vmem:[#allocation11] sm:$0xff]  ;;  %v3534_v4 = vpack.c.bf16 %v212_v2, %v210_v1  ;;  %v211_v5 = vld [vmem:[#allocation11 + $0x10] sm:$0xff]  ;;  %v214_v6 = vld [vmem:[#allocation11 + $0x28] sm:$0xff]  ;;  %vm328_vm1 = vcmask 253952   ;;  %vm225_vm2 = vcmask 523264   ;;  %s3393_s17 = smov 32  }
  0x70   :  { %v216_v7 = vld [vmem:[#allocation11 + $0x38] sm:$0xff]  ;;  %v3536_v8 = vpack.c.bf16 %v211_v5, %v209_v3  ;;  %v115_v10 = vld [vmem:[#allocation9 + $0x8] sm:$0xff]  ;;  %v213_v12 = vld [vmem:[#allocation11 + $0x20] sm:$0xff]  ;;  %v3580_v39 = vshrl.u32 %v124_v38, 7  ;;  %vm1510_vm3 = vcmask 516096   ;;  %vm3396_vm4 = vmmov 0  }
  0x71   :  { %v3538_v9 = vpack.c.bf16 %v216_v7, %v214_v6  ;;  %v117_v11 = vld [vmem:[#allocation9 + $0x18] sm:$0xff]  ;;  %2723 = vmatprep.subr.bf16.mxu1 %v3534_v4  ;;  %v215_v14 = vld [vmem:[#allocation11 + $0x30] sm:$0xff]  ;;  %v114_v15 = vld [vmem:[#allocation9] sm:$0xff]  ;;  %s3397_s23 = smov [#allocation17]  }
  0x72   :  { %v2714_v13 = vpack.c.bf16 %v117_v11, %v115_v10  ;;  %v116_v16 = vld [vmem:[#allocation9 + $0x10] sm:$0xff]  ;;  %2725 = vmatpush1.bf16.msra.mxu1 %v3536_v8  ;;  %v3542_v17 = vpack.c.bf16 %v215_v14, %v213_v12  ;;  %v218_v19 = vld [vmem:[#allocation11 + $0x48] sm:$0xff]  ;;  %v220_v20 = vld [vmem:[#allocation11 + $0x58] sm:$0xff]  ;;  %v126_v40 = vsub.s32 0, %v3580_v39  ;;  %v130_v47 = vsub.s32 1, %v3580_v39  ;;  %s2623_s25 = sshll.u32 %s3397_s23, 4  ;;  %s2624_s25 = int_to_ptr.vmem [resolvable:$true] %s2623_s25 }
  0x73   :  { %v2716_v18 = vpack.c.bf16 %v116_v16, %v114_v15  ;;  %v119_v21 = vld [vmem:[#allocation9 + $0x28] sm:$0xff]  ;;  %2727 = vmatprep.subr.bf16.mxu1 %v3538_v9  ;;  %v3545_v22 = vpack.c.bf16 %v220_v20, %v218_v19  ;;  %v121_v23 = vld [vmem:[#allocation9 + $0x38] sm:$0xff]  ;;  %v217_v24 = vld [vmem:[#allocation11 + $0x40] sm:$0xff]  ;;  %s3349_s27 = scalar_lea.vmem %s2624_s25, 128  ;;  %p3354_p7 = scmp.lt.s32.totalorder %s2624_s25, %s2624_s25 }
  0x74   :  { %2715 = vmatprep.subr.bf16.mxu0 %v2714_v13  ;;  %v219_v25 = vld [vmem:[#allocation11 + $0x50] sm:$0xff]  ;;  %v2718_v26 = vpack.c.bf16 %v121_v23, %v119_v21  ;;  %v118_v27 = vld [vmem:[#allocation9 + $0x20] sm:$0xff]  ;;  %v222_v29 = vld [vmem:[#allocation11 + $0x68] sm:$0xff]  ;;  %p3350_p6 = scmp.ne.s32.totalorder %s2624_s25, %s3349_s27  ;;  %p3355_p8 = scmp.lt.s32.totalorder %s3349_s27, %s3349_s27 }
  0x75   :  { %2717 = vmatpush1.bf16.msra.mxu0 %v2716_v18  ;;  %v120_v28 = vld [vmem:[#allocation9 + $0x30] sm:$0xff]  ;;  %v224_v31 = vld [vmem:[#allocation11 + $0x78] sm:$0xff]  ;;  %v3548_v32 = vpack.c.bf16 %v219_v25, %v217_v24  ;;  %v221_v34 = vld [vmem:[#allocation11 + $0x60] sm:$0xff] }
  0x76   :  { %v2720_v30 = vpack.c.bf16 %v120_v28, %v118_v27  ;;  %2729 = vmatpush1.bf16.msra.mxu1 %v3542_v17  ;;  %2719 = vmatprep.subr.bf16.mxu0 %v2718_v26  ;;  %v3551_v33 = vpack.c.bf16 %v224_v31, %v222_v29  ;;  %v223_v35 = vld [vmem:[#allocation11 + $0x70] sm:$0xff]  ;;  %v113_v36 = vld [vmem:[#allocation6] sm:$0x1]  ;;  %v122_v41 = vld [vmem:[%s3903_s3] sm:$0x3]  ;;  %s3392_s3 = smov 64   ;;  %p3356_p9 = por %p3355_p8, %p3354_p7 }
  0x77   :  { %2731 = vmatprep.subr.bf16.mxu1 %v3545_v22  ;;  %v3555_v37 = vpack.c.bf16 %v223_v35, %v221_v34  ;;  %v127_v42 = vrot.slane %v122_v41, %v126_v40  ;;  %v131_v51 = vrot.slane %v122_v41, %v130_v47 }
  0x78   :  { %p3357_p10 = pnand %p3356_p9, %p3350_p6 }
  0x79   :  { %2721 = vmatpush1.bf16.msra.mxu0 %v2720_v30 }
  0x7a   :  { %2739 = vmatprep.subr.bf16.mxu0 %v3534_v4  ;;  %2733 = vmatpush1.bf16.msra.mxu1 %v3548_v32 }
  0x7b   :  { %2735 = vmatprep.subr.bf16.mxu1 %v3551_v33 }
  0x7c   :  { %2635 = vmatmul.mubr.msk.f32.vlgmr.msra.gmra.mrb[0].mxu0 %vm134_vm0, %v113_v36 }
  0x7d   :  { %2741 = vmatpush1.bf16.msra.mxu0 %v3536_v8  ;;  %416 = vmatprep.mubr.f32.mxu0 %v3391_v0 }
  0x7e   :  { %2743 = vmatprep.subr.bf16.mxu0 %v3538_v9  ;;  %2737 = vmatpush1.bf16.msra.mxu1 %v3555_v37 }
  0x7f   :  { %2755 = vmatprep.subr.bf16.mxu1 %v3534_v4 }
  0x81   :  { %2745 = vmatpush1.bf16.msra.mxu0 %v3542_v17  ;;  %294 = vmatmul.mubr.f32.vlgmr.msra.gmra.mrb[0].mxu1 %v3391_v0 }
  0x82   :  { %2747 = vmatprep.subr.bf16.mxu0 %v3545_v22  ;;  %2757 = vmatpush1.bf16.msra.mxu1 %v3536_v8 }
  0x83   :  { %538 = vmatprep.mubr.f32.mxu1 %v3391_v0  ;;  %2759 = vmatprep.subr.bf16.mxu1 %v3538_v9 }
  0x85   :  { %2749 = vmatpush1.bf16.msra.mxu0 %v3548_v32 }
  0x86   :  { %2751 = vmatprep.subr.bf16.mxu0 %v3551_v33  ;;  %2761 = vmatpush1.bf16.msra.mxu1 %v3542_v17 }
  0x87   :  { %2763 = vmatprep.subr.bf16.mxu1 %v3545_v22 }
  0x89   :  { %2753 = vmatpush1.bf16.msra.mxu0 %v3555_v37 }
  0x8a   :  { %2771 = vmatprep.subr.bf16.mxu0 %v3534_v4  ;;  %2765 = vmatpush1.bf16.msra.mxu1 %v3548_v32 }
  0x8b   :  { %2767 = vmatprep.subr.bf16.mxu1 %v3551_v33 }
  0x8e   :  { %2769 = vmatpush1.bf16.msra.mxu1 %v3555_v37 }
  0x8f   :  { %2787 = vmatprep.subr.bf16.mxu1 %v3534_v4 }
 0x14f   :  { %v204_v43 = vpop.f32.mrb[0].mxu0 }
 0x150   :  { %v206_v44 = vpop.f32.mrb[1].mxu0  ;;  %v3588_v45 = vadd.f32 %v204_v43, %v127_v42 }
 0x151   :  { %v3594_v52 = vadd.f32 %v206_v44, %v131_v51 }
 0x154   :  { %v295_v46 = vpop.f32.mrb[0].mxu1 }
 0x155   :  { %v300_v48 = vadd.f32 %v295_v46, %v3588_v45  ;;  %v297_v49 = vpop.f32.mrb[1].mxu1 }
 0x156   :  { %v301_v53 = vadd.f32 %v297_v49, %v3594_v52 }
 0x157   :  { %v2636_v50 = vmul.f32 -1.442695, %v300_v48 }
 0x158   :  { %v2637_v59 = vmul.f32 -1.442695, %v301_v53 }
 0x159   :  { %3025 = vpow2.f32 %v2636_v50 }
 0x15a   :  { %3027 = vtanh.f32 %v301_v53 }
 0x163   :  { %v3026_v54 = vpop.eup %3025 }
 0x164   :  { %v305_v55 = vadd.f32 1.0, %v3026_v54  ;;  %v3028_v56 = vpop.eup %3027 }
 0x166   :  { %3029 = vrcp.f32 %v305_v55 }
 0x167   :  { %3031 = vpow2.f32 %v2637_v59 }
 0x170   :  { %v3030_v57 = vpop.eup %3029 }
 0x171   :  { %v316_v58 = vmul.f32 %v3030_v57, %v3028_v56  ;;  %v3032_v60 = vpop.eup %3031  ;;  %v315_v62 = vmul.f32 0.0, %v3030_v57 }
 0x172   :  { %v312_v61 = vadd.f32 1.0, %v3032_v60 }
 0x173   :  { %318 = vrot.lane.b32.xlu0 %v316_v58, %s3392_s3 }
 0x174   :  { %3033 = vrcp.f32 %v312_v61 }
 0x17e   :  { %v3034_v2 = vpop.eup %3033 }
 0x1e5   :  { %v319_v63 = vpop.permute.xlu0 %318 }
 0x1e6   :  { %v321_v1 = vadd.f32 %v319_v63, %v315_v62 }
 0x1e8   :  { %3035 = vtanh.f32 %v321_v1 }
 0x1f2   :  { %v3036_v3 = vpop.eup %3035 }
 0x1f3   :  { %v3598_v5 = vmul.f32 %v3036_v3, %v3034_v2 }
 0x1f5   :  { %325 = vrot.lane.b32.xlu0 %v3598_v5, %s3392_s3 }
 0x267   :  { %v326_v6 = vpop.permute.xlu0 %325 }
 0x268   :  { %329 = vst.msk [vmem:[#allocation2] sm:$0x1] %vm328_vm1, %v326_v6  ;;  %2638 = vmatmul.mubr.msk.f32.vlgmr.msra.gmra.mrb[2].mxu0 %vm225_vm2, %v326_v6 }
 0x269   :  { %2773 = vmatpush1.bf16.msra.mxu0 %v3536_v8  ;;  %660 = vmatprep.mubr.f32.mxu0 %v3391_v0 }
 0x26a   :  { %2775 = vmatprep.subr.bf16.mxu0 %v3538_v9 }
 0x26d   :  { %2777 = vmatpush1.bf16.msra.mxu0 %v3542_v17 }
 0x26e   :  { %2779 = vmatprep.subr.bf16.mxu0 %v3545_v22 }
 0x271   :  { %2781 = vmatpush1.bf16.msra.mxu0 %v3548_v32 }
 0x272   :  { %2783 = vmatprep.subr.bf16.mxu0 %v3551_v33 }
 0x275   :  { %2785 = vmatpush1.bf16.msra.mxu0 %v3555_v37 }
 0x276   :  { %2803 = vmatprep.subr.bf16.mxu0 %v3534_v4 }
 0x33b   :  { %v418_v7 = vpop.f32.mrb[2].mxu0 }
 0x33c   :  { %v423_v10 = vadd.f32 %v418_v7, %v3588_v45  ;;  %v420_v11 = vpop.f32.mrb[3].mxu0 }
 0x33d   :  { %v424_v13 = vadd.f32 %v420_v11, %v3594_v52 }
 0x33e   :  { %v2639_v12 = vmul.f32 -1.442695, %v423_v10 }
 0x33f   :  { %v2640_v20 = vmul.f32 -1.442695, %v424_v13 }
 0x340   :  { %3037 = vpow2.f32 %v2639_v12 }
 0x341   :  { %3039 = vtanh.f32 %v424_v13 }
 0x34a   :  { %v3038_v14 = vpop.eup %3037 }
 0x34b   :  { %v428_v15 = vadd.f32 1.0, %v3038_v14  ;;  %v3040_v16 = vpop.eup %3039 }
 0x34d   :  { %3041 = vrcp.f32 %v428_v15 }
 0x34e   :  { %3043 = vpow2.f32 %v2640_v20 }
 0x357   :  { %v3042_v18 = vpop.eup %3041 }
 0x358   :  { %v439_v19 = vmul.f32 %v3042_v18, %v3040_v16  ;;  %v3044_v21 = vpop.eup %3043  ;;  %v438_v24 = vmul.f32 %v3042_v18, %v321_v1 }
 0x359   :  { %v435_v23 = vadd.f32 1.0, %v3044_v21 }
 0x35a   :  { %441 = vrot.lane.b32.xlu1 %v439_v19, %s3392_s3 }
 0x35b   :  { %3045 = vrcp.f32 %v435_v23 }
 0x365   :  { %v3046_v27 = vpop.eup %3045 }
 0x3cc   :  { %v442_v25 = vpop.permute.xlu1 %441 }
 0x3cd   :  { %v444_v26 = vadd.f32 %v442_v25, %v438_v24 }
 0x3cf   :  { %3047 = vtanh.f32 %v444_v26 }
 0x3d9   :  { %v3048_v28 = vpop.eup %3047 }
 0x3da   :  { %v3616_v29 = vmul.f32 %v3048_v28, %v3046_v27 }
 0x3dc   :  { %448 = vrot.lane.b32.xlu1 %v3616_v29, %s3392_s3 }
 0x44e   :  { %v449_v30 = vpop.permute.xlu1 %448 }
 0x44f   :  { %451 = vst.msk [vmem:[#allocation2 + $0x1] sm:$0x1] %vm328_vm1, %v449_v30  ;;  %2641 = vmatmul.mubr.msk.f32.vlgmr.msra.gmra.mrb[2].mxu1 %vm225_vm2, %v449_v30 }
 0x450   :  { %2789 = vmatpush1.bf16.msra.mxu1 %v3536_v8  ;;  %782 = vmatprep.mubr.f32.mxu1 %v3391_v0 }
 0x451   :  { %2791 = vmatprep.subr.bf16.mxu1 %v3538_v9 }
 0x454   :  { %2793 = vmatpush1.bf16.msra.mxu1 %v3542_v17 }
 0x455   :  { %2795 = vmatprep.subr.bf16.mxu1 %v3545_v22 }
 0x458   :  { %2797 = vmatpush1.bf16.msra.mxu1 %v3548_v32 }
 0x459   :  { %2799 = vmatprep.subr.bf16.mxu1 %v3551_v33 }
 0x45c   :  { %2801 = vmatpush1.bf16.msra.mxu1 %v3555_v37 }
 0x45d   :  { %2819 = vmatprep.subr.bf16.mxu1 %v3534_v4 }
 0x522   :  { %v540_v31 = vpop.f32.mrb[2].mxu1 }
 0x523   :  { %v545_v34 = vadd.f32 %v540_v31, %v3588_v45  ;;  %v542_v35 = vpop.f32.mrb[3].mxu1 }
 0x524   :  { %v546_v38 = vadd.f32 %v542_v35, %v3594_v52 }
 0x525   :  { %v2642_v36 = vmul.f32 -1.442695, %v545_v34 }
 0x526   :  { %v2643_v48 = vmul.f32 -1.442695, %v546_v38 }
 0x527   :  { %3049 = vpow2.f32 %v2642_v36 }
 0x528   :  { %3051 = vtanh.f32 %v546_v38 }
 0x531   :  { %v3050_v41 = vpop.eup %3049 }
 0x532   :  { %v550_v42 = vadd.f32 1.0, %v3050_v41  ;;  %v3052_v43 = vpop.eup %3051 }
 0x534   :  { %3053 = vrcp.f32 %v550_v42 }
 0x535   :  { %3055 = vpow2.f32 %v2643_v48 }
 0x53e   :  { %v3054_v44 = vpop.eup %3053 }
 0x53f   :  { %v561_v46 = vmul.f32 %v3054_v44, %v3052_v43  ;;  %v3056_v49 = vpop.eup %3055  ;;  %v560_v51 = vmul.f32 %v3054_v44, %v444_v26 }
 0x540   :  { %v557_v50 = vadd.f32 1.0, %v3056_v49 }
 0x541   :  { %563 = vrot.lane.b32.xlu0 %v561_v46, %s3392_s3 }
 0x542   :  { %3057 = vrcp.f32 %v557_v50 }
 0x54c   :  { %v3058_v55 = vpop.eup %3057 }
 0x5b3   :  { %v564_v53 = vpop.permute.xlu0 %563 }
 0x5b4   :  { %v566_v54 = vadd.f32 %v564_v53, %v560_v51 }
 0x5b6   :  { %3059 = vtanh.f32 %v566_v54 }
 0x5c0   :  { %v3060_v56 = vpop.eup %3059 }
 0x5c1   :  { %v3634_v57 = vmul.f32 %v3060_v56, %v3058_v55 }
 0x5c3   :  { %570 = vrot.lane.b32.xlu1 %v3634_v57, %s3392_s3 }
 0x635   :  { %v571_v58 = vpop.permute.xlu1 %570 }
 0x636   :  { %573 = vst.msk [vmem:[#allocation2 + $0x2] sm:$0x1] %vm328_vm1, %v571_v58  ;;  %2644 = vmatmul.mubr.msk.f32.vlgmr.msra.gmra.mrb[4].mxu0 %vm225_vm2, %v571_v58 }
 0x637   :  { %2805 = vmatpush1.bf16.msra.mxu0 %v3536_v8  ;;  %904 = vmatprep.mubr.f32.mxu0 %v3391_v0 }
 0x638   :  { %2807 = vmatprep.subr.bf16.mxu0 %v3538_v9 }
 0x63b   :  { %2809 = vmatpush1.bf16.msra.mxu0 %v3542_v17 }
 0x63c   :  { %2811 = vmatprep.subr.bf16.mxu0 %v3545_v22 }
 0x63f   :  { %2813 = vmatpush1.bf16.msra.mxu0 %v3548_v32 }
 0x640   :  { %2815 = vmatprep.subr.bf16.mxu0 %v3551_v33 }
 0x643   :  { %2817 = vmatpush1.bf16.msra.mxu0 %v3555_v37 }
 0x644   :  { %2835 = vmatprep.subr.bf16.mxu0 %v3534_v4 }
 0x709   :  { %v662_v59 = vpop.f32.mrb[4].mxu0 }
 0x70a   :  { %v667_v60 = vadd.f32 %v662_v59, %v3588_v45  ;;  %v664_v61 = vpop.f32.mrb[5].mxu0 }
 0x70b   :  { %v668_v63 = vadd.f32 %v664_v61, %v3594_v52 }
 0x70c   :  { %v2645_v62 = vmul.f32 -1.442695, %v667_v60 }
 0x70d   :  { %v2646_v10 = vmul.f32 -1.442695, %v668_v63 }
 0x70e   :  { %3061 = vpow2.f32 %v2645_v62 }
 0x70f   :  { %3063 = vtanh.f32 %v668_v63 }
 0x718   :  { %v3062_v1 = vpop.eup %3061 }
 0x719   :  { %v672_v2 = vadd.f32 1.0, %v3062_v1  ;;  %v3064_v3 = vpop.eup %3063 }
 0x71b   :  { %3065 = vrcp.f32 %v672_v2 }
 0x71c   :  { %3067 = vpow2.f32 %v2646_v10 }
 0x725   :  { %v3066_v6 = vpop.eup %3065 }
 0x726   :  { %v683_v7 = vmul.f32 %v3066_v6, %v3064_v3  ;;  %v3068_v4 = vpop.eup %3067  ;;  %v682_v12 = vmul.f32 %v3066_v6, %v566_v54 }
 0x727   :  { %v679_v11 = vadd.f32 1.0, %v3068_v4 }
 0x728   :  { %685 = vrot.lane.b32.xlu0 %v683_v7, %s3392_s3 }
 0x729   :  { %3069 = vrcp.f32 %v679_v11 }
 0x733   :  { %v3070_v15 = vpop.eup %3069 }
 0x79a   :  { %v686_v13 = vpop.permute.xlu0 %685 }
 0x79b   :  { %v688_v14 = vadd.f32 %v686_v13, %v682_v12 }
 0x79d   :  { %3071 = vtanh.f32 %v688_v14 }
 0x7a7   :  { %v3072_v16 = vpop.eup %3071 }
 0x7a8   :  { %v3652_v18 = vmul.f32 %v3072_v16, %v3070_v15 }
 0x7aa   :  { %692 = vrot.lane.b32.xlu1 %v3652_v18, %s3392_s3 }
 0x81c   :  { %v693_v19 = vpop.permute.xlu1 %692 }
 0x81d   :  { %695 = vst.msk [vmem:[#allocation2 + $0x3] sm:$0x1] %vm328_vm1, %v693_v19  ;;  %2647 = vmatmul.mubr.msk.f32.vlgmr.msra.gmra.mrb[4].mxu1 %vm225_vm2, %v693_v19 }
 0x81e   :  { %2821 = vmatpush1.bf16.msra.mxu1 %v3536_v8  ;;  %1026 = vmatprep.mubr.f32.mxu1 %v3391_v0 }
 0x81f   :  { %2823 = vmatprep.subr.bf16.mxu1 %v3538_v9 }
 0x822   :  { %2825 = vmatpush1.bf16.msra.mxu1 %v3542_v17 }
 0x823   :  { %2827 = vmatprep.subr.bf16.mxu1 %v3545_v22 }
 0x826   :  { %2829 = vmatpush1.bf16.msra.mxu1 %v3548_v32 }
 0x827   :  { %2831 = vmatprep.subr.bf16.mxu1 %v3551_v33 }
 0x82a   :  { %2833 = vmatpush1.bf16.msra.mxu1 %v3555_v37 }
 0x8f0   :  { %v784_v20 = vpop.f32.mrb[4].mxu1 }
 0x8f1   :  { %v789_v21 = vadd.f32 %v784_v20, %v3588_v45  ;;  %v786_v23 = vpop.f32.mrb[5].mxu1 }
 0x8f2   :  { %v790_v25 = vadd.f32 %v786_v23, %v3594_v52 }
 0x8f3   :  { %v2648_v24 = vmul.f32 -1.442695, %v789_v21 }
 0x8f4   :  { %v2649_v34 = vmul.f32 -1.442695, %v790_v25 }
 0x8f5   :  { %3073 = vpow2.f32 %v2648_v24 }
 0x8f6   :  { %3075 = vtanh.f32 %v790_v25 }
 0x8ff   :  { %v3074_v26 = vpop.eup %3073 }
 0x900   :  { %v794_v27 = vadd.f32 1.0, %v3074_v26  ;;  %v3076_v28 = vpop.eup %3075 }
 0x902   :  { %3077 = vrcp.f32 %v794_v27 }
 0x903   :  { %3079 = vpow2.f32 %v2649_v34 }
 0x90c   :  { %v3078_v30 = vpop.eup %3077 }
 0x90d   :  { %v805_v31 = vmul.f32 %v3078_v30, %v3076_v28  ;;  %v3080_v35 = vpop.eup %3079  ;;  %v804_v38 = vmul.f32 %v3078_v30, %v688_v14 }
 0x90e   :  { %v801_v36 = vadd.f32 1.0, %v3080_v35 }
 0x90f   :  { %807 = vrot.lane.b32.xlu0 %v805_v31, %s3392_s3 }
 0x910   :  { %3081 = vrcp.f32 %v801_v36 }
 0x91a   :  { %v3082_v43 = vpop.eup %3081 }
 0x981   :  { %v808_v41 = vpop.permute.xlu0 %807 }
 0x982   :  { %v810_v42 = vadd.f32 %v808_v41, %v804_v38 }
 0x984   :  { %3083 = vtanh.f32 %v810_v42 }
 0x98e   :  { %v3084_v44 = vpop.eup %3083 }
 0x98f   :  { %v3669_v46 = vmul.f32 %v3084_v44, %v3082_v43 }
 0x991   :  { %814 = vrot.lane.b32.xlu1 %v3669_v46, %s3392_s3 }
 0xa03   :  { %v815_v48 = vpop.permute.xlu1 %814 }
 0xa04   :  { %817 = vst.msk [vmem:[#allocation2 + $0x4] sm:$0x1] %vm328_vm1, %v815_v48  ;;  %2650 = vmatmul.mubr.msk.f32.vlgmr.msra.gmra.mrb[6].mxu0 %vm225_vm2, %v815_v48  ;;  %v1201_v48 = vld [vmem:[#allocation12 + $0x58] sm:$0xff] }
 0xa05   :  { %2837 = vmatpush1.bf16.msra.mxu0 %v3536_v8  ;;  %1148 = vmatprep.mubr.f32.mxu0 %v3391_v0 }
 0xa06   :  { %2839 = vmatprep.subr.bf16.mxu0 %v3538_v9 }
 0xa09   :  { %2841 = vmatpush1.bf16.msra.mxu0 %v3542_v17 }
 0xa0a   :  { %2843 = vmatprep.subr.bf16.mxu0 %v3545_v22 }
 0xa0d   :  { %2845 = vmatpush1.bf16.msra.mxu0 %v3548_v32 }
 0xa0e   :  { %2847 = vmatprep.subr.bf16.mxu0 %v3551_v33 }
 0xa11   :  { %2849 = vmatpush1.bf16.msra.mxu0 %v3555_v37 }
 0xad7   :  { %v906_v49 = vpop.f32.mrb[6].mxu0 }
 0xad8   :  { %v911_v50 = vadd.f32 %v906_v49, %v3588_v45  ;;  %v908_v51 = vpop.f32.mrb[7].mxu0 }
 0xad9   :  { %v912_v8 = vadd.f32 %v908_v51, %v3594_v52 }
 0xada   :  { %v2651_v53 = vmul.f32 -1.442695, %v911_v50 }
 0xadb   :  { %v2652_v32 = vmul.f32 -1.442695, %v912_v8 }
 0xadc   :  { %3085 = vpow2.f32 %v2651_v53 }
 0xadd   :  { %3087 = vtanh.f32 %v912_v8 }
 0xae6   :  { %v3086_v54 = vpop.eup %3085 }
 0xae7   :  { %v916_v9 = vadd.f32 1.0, %v3086_v54  ;;  %v3088_v17 = vpop.eup %3087  ;;  %v1198_v54 = vld [vmem:[#allocation12 + $0x40] sm:$0xff] }
 0xae9   :  { %3089 = vrcp.f32 %v916_v9  ;;  %v1200_v9 = vld [vmem:[#allocation12 + $0x50] sm:$0xff] }
 0xaea   :  { %3091 = vpow2.f32 %v2652_v32 }
 0xaf3   :  { %v3090_v22 = vpop.eup %3089 }
 0xaf4   :  { %v927_v55 = vmul.f32 %v3090_v22, %v3088_v17  ;;  %v3092_v33 = vpop.eup %3091  ;;  %v926_v56 = vmul.f32 %v3090_v22, %v810_v42  ;;  %v2852_v17 = vpack.c.bf16 %v1200_v9, %v1198_v54  ;;  %v1205_v22 = vld [vmem:[#allocation12 + $0x78] sm:$0xff]  ;;  %v1354_v54 = vld [vmem:[%s3906_s6] sm:$0x3] }
 0xaf5   :  { %v923_v37 = vadd.f32 1.0, %v3092_v33  ;;  %v1374_v33 = vld [vmem:[#allocation14 + $0x18] sm:$0xff] }
 0xaf6   :  { %929 = vrot.lane.b32.xlu0 %v927_v55, %s3392_s3  ;;  %v1372_v55 = vld [vmem:[#allocation14 + $0x8] sm:$0xff] }
 0xaf7   :  { %3093 = vrcp.f32 %v923_v37  ;;  %v1202_v37 = vld [vmem:[#allocation12 + $0x60] sm:$0xff] }
 0xb01   :  { %v3094_v60 = vpop.eup %3093 }
 0xb68   :  { %v930_v58 = vpop.permute.xlu0 %929 }
 0xb69   :  { %v932_v59 = vadd.f32 %v930_v58, %v926_v56  ;;  %v1204_v56 = vld [vmem:[#allocation12 + $0x70] sm:$0xff]  ;;  %v3721_v58 = vpack.c.bf16 %v1374_v33, %v1372_v55 }
 0xb6b   :  { %3095 = vtanh.f32 %v932_v59  ;;  %2867 = vmatprep.subr.bf16.mxu0 %v3721_v58 }
 0xb75   :  { %v3096_v61 = vpop.eup %3095 }
 0xb76   :  { %v3686_v62 = vmul.f32 %v3096_v61, %v3094_v60  ;;  %v1371_v60 = vld [vmem:[#allocation14] sm:$0xff]  ;;  %v1373_v61 = vld [vmem:[#allocation14 + $0x10] sm:$0xff] }
 0xb78   :  { %936 = vrot.lane.b32.xlu1 %v3686_v62, %s3392_s3 }
 0xbea   :  { %v937_v63 = vpop.permute.xlu1 %936 }
 0xbeb   :  { %939 = vst.msk [vmem:[#allocation2 + $0x5] sm:$0x1] %vm328_vm1, %v937_v63  ;;  %2653 = vmatmul.mubr.msk.f32.vlgmr.msra.gmra.mrb[6].mxu1 %vm225_vm2, %v937_v63  ;;  %v3723_v63 = vpack.c.bf16 %v1373_v61, %v1371_v60 }
 0xbec   :  { %1273 = vmatprep.mubr.f32.mxu1 %v3391_v0 }
 0xcbe   :  { %v1028_v1 = vpop.f32.mrb[6].mxu1 }
 0xcbf   :  { %v1033_v2 = vadd.f32 %v1028_v1, %v3588_v45  ;;  %v1030_v3 = vpop.f32.mrb[7].mxu1  ;;  %v1192_v1 = vld [vmem:[#allocation12 + $0x18] sm:$0xff] }
 0xcc0   :  { %v1034_v7 = vadd.f32 %v1030_v3, %v3594_v52  ;;  %v1378_v3 = vld [vmem:[#allocation14 + $0x38] sm:$0xff] }
 0xcc1   :  { %v2654_v6 = vmul.f32 -1.442695, %v1033_v2  ;;  %v1376_v2 = vld [vmem:[#allocation14 + $0x28] sm:$0xff] }
 0xcc2   :  { %v2655_v14 = vmul.f32 -1.442695, %v1034_v7 }
 0xcc3   :  { %3097 = vpow2.f32 %v2654_v6 }
 0xcc4   :  { %3099 = vtanh.f32 %v1034_v7  ;;  %v3726_v7 = vpack.c.bf16 %v1378_v3, %v1376_v2 }
 0xccd   :  { %v3098_v10 = vpop.eup %3097 }
 0xcce   :  { %v1038_v4 = vadd.f32 1.0, %v3098_v10  ;;  %v3100_v11 = vpop.eup %3099 }
 0xcd0   :  { %3101 = vrcp.f32 %v1038_v4  ;;  %v1375_v4 = vld [vmem:[#allocation14 + $0x20] sm:$0xff] }
 0xcd1   :  { %3103 = vpow2.f32 %v2655_v14  ;;  %v1382_v14 = vld [vmem:[#allocation14 + $0x58] sm:$0xff] }
 0xcda   :  { %v3102_v12 = vpop.eup %3101 }
 0xcdb   :  { %v1049_v13 = vmul.f32 %v3102_v12, %v3100_v11  ;;  %v3104_v15 = vpop.eup %3103  ;;  %v1048_v19 = vmul.f32 %v3102_v12, %v932_v59  ;;  %v2856_v59 = vpack.c.bf16 %v1204_v56, %v1202_v37  ;;  %v1377_v11 = vld [vmem:[#allocation14 + $0x30] sm:$0xff] }
 0xcdc   :  { %v1045_v16 = vadd.f32 1.0, %v3104_v15  ;;  %v3731_v12 = vpack.c.bf16 %v1377_v11, %v1375_v4 }
 0xcdd   :  { %1051 = vrot.lane.b32.xlu0 %v1049_v13, %s3392_s3  ;;  %v1380_v13 = vld [vmem:[#allocation14 + $0x48] sm:$0xff] }
 0xcde   :  { %3105 = vrcp.f32 %v1045_v16 }
 0xce8   :  { %v3106_v23 = vpop.eup %3105 }
 0xd4f   :  { %v1052_v20 = vpop.permute.xlu0 %1051 }
 0xd50   :  { %v1054_v21 = vadd.f32 %v1052_v20, %v1048_v19  ;;  %v3734_v19 = vpack.c.bf16 %v1382_v14, %v1380_v13  ;;  %v1379_v20 = vld [vmem:[#allocation14 + $0x40] sm:$0xff] }
 0xd52   :  { %3107 = vtanh.f32 %v1054_v21 }
 0xd5c   :  { %v3108_v24 = vpop.eup %3107 }
 0xd5d   :  { %v1056_v25 = vmul.f32 %v3108_v24, %v3106_v23  ;;  %v1381_v23 = vld [vmem:[#allocation14 + $0x50] sm:$0xff] }
 0xd5f   :  { %1058 = vrot.lane.b32.xlu1 %v1056_v25, %s3392_s3 }
 0xd63   :  { %330 = vrot.lane.b32.xlu1 %v3598_v5, %s3393_s17 }
 0xd67   :  { %574 = vrot.lane.b32.xlu1 %v3634_v57, %s3393_s17 }
 0xd6b   :  { %818 = vrot.lane.b32.xlu1 %v3669_v46, %s3393_s17  ;;  %v1199_v46 = vld [vmem:[#allocation12 + $0x48] sm:$0xff] }
 0xd6c   :  { %v2850_v49 = vpack.c.bf16 %v1201_v48, %v1199_v46  ;;  %v1195_v46 = vld [vmem:[#allocation12 + $0x30] sm:$0xff] }
 0xd6e   :  { %2851 = vmatprep.subr.bf16.mxu1 %v2850_v49 }
 0xd6f   :  { %1062 = vrot.lane.b32.xlu1 %v1056_v25, %s3393_s17  ;;  %2853 = vmatpush1.bf16.msra.mxu1 %v2852_v17  ;;  %v3738_v25 = vpack.c.bf16 %v1381_v23, %v1379_v20  ;;  %v1359_v17 = vrot.slane %v1354_v54, %v126_v40 }
 0xdd1   :  { %v1059_v26 = vpop.permute.xlu1 %1058 }
 0xdd2   :  { %1061 = vst.msk [vmem:[#allocation2 + $0x6] sm:$0x1] %vm328_vm1, %v1059_v26  ;;  %2656 = vmatmul.mubr.msk.f32.vlgmr.msra.gmra.mrb[8].mxu0 %vm225_vm2, %v1059_v26  ;;  %v1384_v26 = vld [vmem:[#allocation14 + $0x68] sm:$0xff] }
 0xdd3   :  { %1451 = vmatprep.mubr.f32.mxu0 %v3391_v0  ;;  %2869 = vmatpush1.bf16.msra.mxu0 %v3723_v63 }
 0xdd4   :  { %2871 = vmatprep.subr.bf16.mxu0 %v3726_v7 }
 0xdd5   :  { %v331_v27 = vpop.permute.xlu1 %330 }
 0xdd6   :  { %333 = vst.msk [vmem:[#allocation3 + $0x7] sm:$0x1] %vm328_vm1, %v331_v27  ;;  %v1386_v27 = vld [vmem:[#allocation14 + $0x78] sm:$0xff] }
 0xdd7   :  { %2873 = vmatpush1.bf16.msra.mxu0 %v3731_v12 }
 0xdd8   :  { %2875 = vmatprep.subr.bf16.mxu0 %v3734_v19 }
 0xdd9   :  { %v575_v28 = vpop.permute.xlu1 %574 }
 0xdda   :  { %577 = vst.msk [vmem:[#allocation3 + $0x5] sm:$0x1] %vm328_vm1, %v575_v28  ;;  %v3742_v28 = vpack.c.bf16 %v1386_v27, %v1384_v26 }
 0xddb   :  { %2877 = vmatpush1.bf16.msra.mxu0 %v3738_v25 }
 0xddc   :  { %2879 = vmatprep.subr.bf16.mxu0 %v3742_v28 }
 0xddd   :  { %v819_v5 = vpop.permute.xlu1 %818 }
 0xdde   :  { %821 = vst.msk [vmem:[#allocation3 + $0x3] sm:$0x1] %vm328_vm1, %v819_v5  ;;  %v1383_v5 = vld [vmem:[#allocation14 + $0x60] sm:$0xff] }
 0xde1   :  { %v1063_v57 = vpop.permute.xlu1 %1062 }
 0xde2   :  { %1065 = vst.msk [vmem:[#allocation3 + $0x1] sm:$0x1] %vm328_vm1, %v1063_v57  ;;  %v1385_v57 = vld [vmem:[#allocation14 + $0x70] sm:$0xff] }
 0xea5   :  { %v1150_v30 = vpop.f32.mrb[8].mxu0 }
 0xea6   :  { %v1155_v31 = vadd.f32 %v1150_v30, %v3588_v45  ;;  %v1152_v34 = vpop.f32.mrb[9].mxu0  ;;  %v3745_v30 = vpack.c.bf16 %v1385_v57, %v1383_v5 }
 0xea7   :  { %v1156_v36 = vadd.f32 %v1152_v34, %v3594_v52 }
 0xea8   :  { %v2657_v35 = vmul.f32 -1.442695, %v1155_v31  ;;  %2881 = vmatpush1.bf16.msra.mxu0 %v3745_v30 }
 0xea9   :  { %v2658_v45 = vmul.f32 -1.442695, %v1156_v36  ;;  %2899 = vmatprep.subr.bf16.mxu0 %v3721_v58 }
 0xeaa   :  { %3109 = vpow2.f32 %v2657_v35  ;;  %v1189_v35 = vld [vmem:[#allocation12] sm:$0xff] }
 0xeab   :  { %3111 = vtanh.f32 %v1156_v36  ;;  %1452 = vmatmul.mubr.f32.vlgmr.msra.gmra.mrb[10].mxu0 %v3391_v0  ;;  %v1191_v36 = vld [vmem:[#allocation12 + $0x10] sm:$0xff] }
 0xeac   :  { %2901 = vmatpush1.bf16.msra.mxu0 %v3723_v63  ;;  %1742 = vmatprep.mubr.f32.mxu0 %v3391_v0 }
 0xead   :  { %2903 = vmatprep.subr.bf16.mxu0 %v3726_v7 }
 0xeb0   :  { %2905 = vmatpush1.bf16.msra.mxu0 %v3731_v12 }
 0xeb1   :  { %2907 = vmatprep.subr.bf16.mxu0 %v3734_v19 }
 0xeb4   :  { %v3110_v38 = vpop.eup %3109  ;;  %2909 = vmatpush1.bf16.msra.mxu0 %v3738_v25 }
 0xeb5   :  { %v1160_v41 = vadd.f32 1.0, %v3110_v38  ;;  %v3112_v42 = vpop.eup %3111  ;;  %2911 = vmatprep.subr.bf16.mxu0 %v3742_v28  ;;  %v1194_v38 = vld [vmem:[#allocation12 + $0x28] sm:$0xff] }
 0xeb7   :  { %3113 = vrcp.f32 %v1160_v41  ;;  %v1196_v41 = vld [vmem:[#allocation12 + $0x38] sm:$0xff] }
 0xeb8   :  { %3115 = vpow2.f32 %v2658_v45  ;;  %2913 = vmatpush1.bf16.msra.mxu0 %v3745_v30 }
 0xeb9   :  { %2931 = vmatprep.subr.bf16.mxu0 %v3721_v58 }
 0xec1   :  { %v3114_v43 = vpop.eup %3113 }
 0xec2   :  { %v1171_v44 = vmul.f32 %v3114_v43, %v3112_v42  ;;  %v3116_v52 = vpop.eup %3115  ;;  %v1170_v51 = vmul.f32 %v3114_v43, %v1054_v21  ;;  %v2860_v42 = vpack.c.bf16 %v1191_v36, %v1189_v35  ;;  %v2862_v43 = vpack.c.bf16 %v1196_v41, %v1194_v38 }
 0xec3   :  { %v1167_v50 = vadd.f32 1.0, %v3116_v52 }
 0xec4   :  { %1173 = vrot.lane.b32.xlu0 %v1171_v44, %s3392_s3  ;;  %v1193_v44 = vld [vmem:[#allocation12 + $0x20] sm:$0xff] }
 0xec5   :  { %3117 = vrcp.f32 %v1167_v50  ;;  %v2864_v49 = vpack.c.bf16 %v1195_v46, %v1193_v44 }
 0xec8   :  { %452 = vrot.lane.b32.xlu0 %v3616_v29, %s3393_s17  ;;  %v1203_v29 = vld [vmem:[#allocation12 + $0x68] sm:$0xff] }
 0xecc   :  { %696 = vrot.lane.b32.xlu0 %v3652_v18, %s3393_s17  ;;  %v2854_v18 = vpack.c.bf16 %v1205_v22, %v1203_v29  ;;  %v1363_v29 = vrot.slane %v1354_v54, %v130_v47 }
 0xece   :  { %2855 = vmatprep.subr.bf16.mxu1 %v2854_v18 }
 0xecf   :  { %2857 = vmatpush1.bf16.msra.mxu1 %v2856_v59  ;;  %v3118_v15 = vpop.eup %3117 }
 0xed0   :  { %940 = vrot.lane.b32.xlu0 %v3686_v62, %s3393_s17  ;;  %v1190_v62 = vld [vmem:[#allocation12 + $0x8] sm:$0xff] }
 0xed1   :  { %v2858_v6 = vpack.c.bf16 %v1192_v1, %v1190_v62 }
 0xed3   :  { %2859 = vmatprep.subr.bf16.mxu1 %v2858_v6 }
 0xf36   :  { %v1174_v53 = vpop.permute.xlu0 %1173 }
 0xf37   :  { %v1176_v8 = vadd.f32 %v1174_v53, %v1170_v51  ;;  %v3394_v53 = vmov 1966171168  }
 0xf39   :  { %3119 = vtanh.f32 %v1176_v8  ;;  %v1462_v8 = vunpack.c.l.s4 %v3394_v53 }
 0xf3a   :  { %v453_v32 = vpop.permute.xlu0 %452 }
 0xf3b   :  { %455 = vst.msk [vmem:[#allocation3 + $0x6] sm:$0x1] %vm328_vm1, %v453_v32  ;;  %v1463_v9 = vunpack.c.0.s8 %v1462_v8 }
 0xf3d   :  { %v3783_v22 = vsub.s32 %v1463_v9, %v3580_v39 }
 0xf3e   :  { %v697_v10 = vpop.permute.xlu0 %696 }
 0xf3f   :  { %699 = vst.msk [vmem:[#allocation3 + $0x4] sm:$0x1] %vm328_vm1, %v697_v10 }
 0xf42   :  { %v941_v16 = vpop.permute.xlu0 %940 }
 0xf43   :  { %v3120_v21 = vpop.eup %3119  ;;  %943 = vst.msk [vmem:[#allocation3 + $0x2] sm:$0x1] %vm328_vm1, %v941_v16 }
 0xf44   :  { %v1178_v24 = vmul.f32 %v3120_v21, %v3118_v15 }
 0xf46   :  { %1180 = vrot.lane.b32.xlu1 %v1178_v24, %s3392_s3  ;;  %1184 = vrot.lane.b32.xlu0 %v1178_v24, %s3393_s17 }
 0xf7e   :  { %v1453_v52 = vpop.f32.mrb[10].mxu0 }
 0xf7f   :  { %v1455_v50 = vpop.f32.mrb[11].mxu0 }
 0xf80   :  { %v1460_v51 = vcombine.low %v1453_v52, %v1455_v50 }
 0xf82   :  { %v1467_v37 = vrot.slane %v1460_v51, %v3783_v22 }
 0xf84   :  { %v1474_v56 = vrot.slane %v1467_v37, %v3783_v22 }
 0xfb8   :  { %v1185_v31 = vpop.permute.xlu0 %1184  ;;  %v1181_v34 = vpop.permute.xlu1 %1180 }
 0xfb9   :  { %1187 = vst.msk [vmem:[#allocation3] sm:$0x1] %vm328_vm1, %v1185_v31  ;;  %1183 = vst.msk [vmem:[#allocation2 + $0x7] sm:$0x1] %vm328_vm1, %v1181_v34 }
 0xfc0   :  { %v1197_v48 = vld [vmem:[#allocation3] sm:$0xff]  ;;  %v1188_v45 = vld [vmem:[#allocation2] sm:$0xff] }
 0xfc1   :  { %2659 = vmatmul.mubr.msk.f32.vlgmr.msra.gmra.mrb[8].mxu1 %vm134_vm0, %v1197_v48 }
 0xfc2   :  { %2861 = vmatpush1.bf16.msra.mxu1 %v2860_v42  ;;  %1347 = vmatprep.mubr.f32.mxu1 %v3391_v0 }
 0xfc3   :  { %2863 = vmatprep.subr.bf16.mxu1 %v2862_v43 }
 0xfc6   :  { %2865 = vmatpush1.bf16.msra.mxu1 %v2864_v49 }
 0xfc7   :  { %2883 = vmatprep.subr.bf16.mxu1 %v3721_v58 }
 0xfc9   :  { %2660 = vmatmul.mubr.msk.f32.vlgmr.msra.gmra.mrb[8].mxu1 %vm134_vm0, %v1188_v45 }
 0xfca   :  { %2885 = vmatpush1.bf16.msra.mxu1 %v3723_v63  ;;  %1597 = vmatprep.mubr.f32.mxu1 %v3391_v0 }
 0xfcb   :  { %2887 = vmatprep.subr.bf16.mxu1 %v3726_v7 }
 0xfce   :  { %2889 = vmatpush1.bf16.msra.mxu1 %v3731_v12 }
 0xfcf   :  { %2891 = vmatprep.subr.bf16.mxu1 %v3734_v19 }
 0xfd2   :  { %2893 = vmatpush1.bf16.msra.mxu1 %v3738_v25 }
 0xfd3   :  { %2895 = vmatprep.subr.bf16.mxu1 %v3742_v28 }
 0xfd6   :  { %2897 = vmatpush1.bf16.msra.mxu1 %v3745_v30 }
 0xfd7   :  { %2915 = vmatprep.subr.bf16.mxu1 %v3721_v58 }
0x109c   :  { %v1349_v55 = vpop.f32.mrb[8].mxu1 }
0x109d   :  { %v1366_v32 = vadd.f32 %v1359_v17, %v1349_v55  ;;  %v1351_v18 = vpop.f32.mrb[9].mxu1 }
0x109e   :  { %v1367_v33 = vadd.f32 %v1363_v29, %v1351_v18 }
0x109f   :  { %1368 = vst [vmem:[#allocation4] sm:$0xff] %v1366_v32 }
0x10a0   :  { %1369 = vst [vmem:[#allocation4 + $0x8] sm:$0xff] %v1367_v33 }
0x10a7   :  { %v1370_v59 = vld [vmem:[#allocation4] ss:$8 sm:$0x3]  ;;  %v1513_v31 = vld [vmem:[#allocation4 + $0x1] ss:$8 sm:$0x3] }
0x10a8   :  { %v1476_v60 = vadd.f32 %v1474_v56, %v1370_v59  ;;  %v1658_v37 = vld [vmem:[#allocation4 + $0x2] ss:$8 sm:$0x3] }
0x10aa   :  { %1487 = vrot.lane.b32.xlu1 %v1476_v60, %s3392_s3  ;;  %v2661_v40 = vmul.f32 -1.442695, %v1476_v60  ;;  %v1484_v47 = vrot.slane %v1476_v60, 1 }
0x10ac   :  { %3121 = vpow2.f32 %v2661_v40 }
0x10ad   :  { %3123 = vtanh.f32 %v1484_v47 }
0x10b6   :  { %v3122_v61 = vpop.eup %3121 }
0x10b7   :  { %v1480_v39 = vadd.f32 1.0, %v3122_v61  ;;  %v3124_v62 = vpop.eup %3123 }
0x10b9   :  { %3125 = vrcp.f32 %v1480_v39 }
0x10c3   :  { %v3126_v1 = vpop.eup %3125 }
0x10c4   :  { %v1498_v2 = vmul.f32 %v3126_v1, %v3124_v62  ;;  %v1497_v3 = vmul.f32 0.0, %v3126_v1 }
0x10c6   :  { %1500 = vrot.lane.b32.xlu0 %v1498_v2, %s3392_s3 }
0x111c   :  { %v1488_v11 = vpop.permute.xlu1 %1487 }
0x111d   :  { %v1489_v13 = vrot.slane %v1488_v11, 1 }
0x111f   :  { %v2662_v14 = vmul.f32 -1.442695, %v1489_v13 }
0x1138   :  { %v1501_v6 = vpop.permute.xlu0 %1500 }
0x1139   :  { %v1503_v10 = vadd.f32 %v1501_v6, %v1497_v3 }
0x113b   :  { %3127 = vtanh.f32 %v1503_v10 }
0x113c   :  { %3129 = vpow2.f32 %v2662_v14 }
0x1145   :  { %v3128_v4 = vpop.eup %3127 }
0x1146   :  { %1506 = vrot.lane.b32.xlu0 %v3128_v4, %s3392_s3  ;;  %v3130_v15 = vpop.eup %3129 }
0x1147   :  { %v1494_v16 = vadd.f32 1.0, %v3130_v15 }
0x1149   :  { %3131 = vrcp.f32 %v1494_v16 }
0x1153   :  { %v3132_v20 = vpop.eup %3131 }
0x11b8   :  { %v1507_v21 = vpop.permute.xlu0 %1506 }
0x11b9   :  { %v1509_v23 = vmul.f32 %v3132_v20, %v1507_v21 }
0x11bb   :  { %1511 = vst.msk [vmem:[#allocation5] sm:$0x1] %vm1510_vm3, %v1509_v23  ;;  %2663 = vmatmul.mubr.msk.f32.vlgmr.msra.gmra.mrb[10].mxu1 %vm225_vm2, %v1509_v23 }
0x11bc   :  { %2917 = vmatpush1.bf16.msra.mxu1 %v3723_v63  ;;  %1887 = vmatprep.mubr.f32.mxu1 %v3391_v0 }
0x11bd   :  { %2919 = vmatprep.subr.bf16.mxu1 %v3726_v7 }
0x11c0   :  { %2921 = vmatpush1.bf16.msra.mxu1 %v3731_v12 }
0x11c1   :  { %2923 = vmatprep.subr.bf16.mxu1 %v3734_v19 }
0x11c4   :  { %2925 = vmatpush1.bf16.msra.mxu1 %v3738_v25 }
0x11c5   :  { %2927 = vmatprep.subr.bf16.mxu1 %v3742_v28 }
0x11c8   :  { %2929 = vmatpush1.bf16.msra.mxu1 %v3745_v30 }
0x11c9   :  { %2947 = vmatprep.subr.bf16.mxu1 %v3721_v58 }
0x128e   :  { %v1599_v24 = vpop.f32.mrb[10].mxu1 }
0x128f   :  { %v1601_v26 = vpop.f32.mrb[11].mxu1 }
0x1290   :  { %v1606_v27 = vcombine.low %v1599_v24, %v1601_v26 }
0x1292   :  { %v1613_v5 = vrot.slane %v1606_v27, %v3783_v22 }
0x1294   :  { %v1620_v57 = vrot.slane %v1613_v5, %v3783_v22  ;;  %v1803_v5 = vld [vmem:[#allocation4 + $0x3] ss:$8 sm:$0x3] }
0x1296   :  { %v1622_v34 = vadd.f32 %v1620_v57, %v1513_v31 }
0x1298   :  { %1633 = vrot.lane.b32.xlu0 %v1622_v34, %s3392_s3  ;;  %v2664_v35 = vmul.f32 -1.442695, %v1622_v34  ;;  %v1630_v36 = vrot.slane %v1622_v34, 1 }
0x129a   :  { %3133 = vpow2.f32 %v2664_v35 }
0x129b   :  { %3135 = vtanh.f32 %v1630_v36 }
0x12a4   :  { %v3134_v38 = vpop.eup %3133 }
0x12a5   :  { %v1626_v41 = vadd.f32 1.0, %v3134_v38  ;;  %v3136_v42 = vpop.eup %3135 }
0x12a7   :  { %3137 = vrcp.f32 %v1626_v41 }
0x12b1   :  { %v3138_v43 = vpop.eup %3137 }
0x12b2   :  { %v1644_v44 = vmul.f32 %v3138_v43, %v3136_v42  ;;  %v1643_v46 = vmul.f32 %v3138_v43, %v1503_v10 }
0x12b4   :  { %1646 = vrot.lane.b32.xlu1 %v1644_v44, %s3392_s3 }
0x130a   :  { %v1634_v52 = vpop.permute.xlu0 %1633 }
0x130b   :  { %v1635_v50 = vrot.slane %v1634_v52, 1 }
0x130d   :  { %v2665_v51 = vmul.f32 -1.442695, %v1635_v50 }
0x1326   :  { %v1647_v48 = vpop.permute.xlu1 %1646 }
0x1327   :  { %v1649_v49 = vadd.f32 %v1647_v48, %v1643_v46 }
0x1329   :  { %3139 = vtanh.f32 %v1649_v49 }
0x132a   :  { %3141 = vpow2.f32 %v2665_v51 }
0x1333   :  { %v3140_v45 = vpop.eup %3139 }
0x1334   :  { %1652 = vrot.lane.b32.xlu1 %v3140_v45, %s3392_s3  ;;  %v3142_v53 = vpop.eup %3141 }
0x1335   :  { %v1640_v8 = vadd.f32 1.0, %v3142_v53 }
0x1337   :  { %3143 = vrcp.f32 %v1640_v8 }
0x1341   :  { %v3144_v54 = vpop.eup %3143 }
0x13a6   :  { %v1653_v9 = vpop.permute.xlu1 %1652 }
0x13a7   :  { %v1655_v17 = vmul.f32 %v3144_v54, %v1653_v9 }
0x13a9   :  { %1656 = vst.msk [vmem:[#allocation5 + $0x1] sm:$0x1] %vm1510_vm3, %v1655_v17  ;;  %2666 = vmatmul.mubr.msk.f32.vlgmr.msra.gmra.mrb[12].mxu0 %vm225_vm2, %v1655_v17 }
0x13aa   :  { %2933 = vmatpush1.bf16.msra.mxu0 %v3723_v63  ;;  %2032 = vmatprep.mubr.f32.mxu0 %v3391_v0 }
0x13ab   :  { %2935 = vmatprep.subr.bf16.mxu0 %v3726_v7 }
0x13ae   :  { %2937 = vmatpush1.bf16.msra.mxu0 %v3731_v12 }
0x13af   :  { %2939 = vmatprep.subr.bf16.mxu0 %v3734_v19 }
0x13b2   :  { %2941 = vmatpush1.bf16.msra.mxu0 %v3738_v25 }
0x13b3   :  { %2943 = vmatprep.subr.bf16.mxu0 %v3742_v28 }
0x13b6   :  { %2945 = vmatpush1.bf16.msra.mxu0 %v3745_v30 }
0x13b7   :  { %2963 = vmatprep.subr.bf16.mxu0 %v3721_v58 }
0x147c   :  { %v1744_v29 = vpop.f32.mrb[12].mxu0 }
0x147d   :  { %v1746_v55 = vpop.f32.mrb[13].mxu0 }
0x147e   :  { %v1751_v32 = vcombine.low %v1744_v29, %v1746_v55 }
0x1480   :  { %v1758_v18 = vrot.slane %v1751_v32, %v3783_v22  ;;  %v1948_v32 = vld [vmem:[#allocation4 + $0x4] ss:$8 sm:$0x3] }
0x1482   :  { %v1765_v33 = vrot.slane %v1758_v18, %v3783_v22 }
0x1484   :  { %v1767_v56 = vadd.f32 %v1765_v33, %v1658_v37 }
0x1486   :  { %1778 = vrot.lane.b32.xlu1 %v1767_v56, %s3392_s3  ;;  %v2667_v59 = vmul.f32 -1.442695, %v1767_v56  ;;  %v1775_v60 = vrot.slane %v1767_v56, 1 }
0x1488   :  { %3145 = vpow2.f32 %v2667_v59 }
0x1489   :  { %3147 = vtanh.f32 %v1775_v60 }
0x1492   :  { %v3146_v40 = vpop.eup %3145 }
0x1493   :  { %v1771_v47 = vadd.f32 1.0, %v3146_v40  ;;  %v3148_v61 = vpop.eup %3147 }
0x1495   :  { %3149 = vrcp.f32 %v1771_v47 }
0x149f   :  { %v3150_v39 = vpop.eup %3149 }
0x14a0   :  { %v1789_v62 = vmul.f32 %v3150_v39, %v3148_v61  ;;  %v1788_v1 = vmul.f32 %v3150_v39, %v1649_v49 }
0x14a2   :  { %1791 = vrot.lane.b32.xlu0 %v1789_v62, %s3392_s3 }
0x14f8   :  { %v1779_v10 = vpop.permute.xlu1 %1778 }
0x14f9   :  { %v1780_v4 = vrot.slane %v1779_v10, 1 }
0x14fb   :  { %v2668_v11 = vmul.f32 -1.442695, %v1780_v4 }
0x1514   :  { %v1792_v2 = vpop.permute.xlu0 %1791 }
0x1515   :  { %v1794_v3 = vadd.f32 %v1792_v2, %v1788_v1 }
0x1517   :  { %3151 = vtanh.f32 %v1794_v3 }
0x1518   :  { %3153 = vpow2.f32 %v2668_v11 }
0x1521   :  { %v3152_v6 = vpop.eup %3151 }
0x1522   :  { %1797 = vrot.lane.b32.xlu0 %v3152_v6, %s3392_s3  ;;  %v3154_v13 = vpop.eup %3153 }
0x1523   :  { %v1785_v14 = vadd.f32 1.0, %v3154_v13 }
0x1525   :  { %3155 = vrcp.f32 %v1785_v14 }
0x152f   :  { %v3156_v15 = vpop.eup %3155 }
0x1594   :  { %v1798_v16 = vpop.permute.xlu0 %1797 }
0x1595   :  { %v1800_v20 = vmul.f32 %v3156_v15, %v1798_v16 }
0x1597   :  { %1801 = vst.msk [vmem:[#allocation5 + $0x2] sm:$0x1] %vm1510_vm3, %v1800_v20  ;;  %2669 = vmatmul.mubr.msk.f32.vlgmr.msra.gmra.mrb[12].mxu1 %vm225_vm2, %v1800_v20 }
0x1598   :  { %2949 = vmatpush1.bf16.msra.mxu1 %v3723_v63  ;;  %2177 = vmatprep.mubr.f32.mxu1 %v3391_v0 }
0x1599   :  { %2951 = vmatprep.subr.bf16.mxu1 %v3726_v7 }
0x159c   :  { %2953 = vmatpush1.bf16.msra.mxu1 %v3731_v12 }
0x159d   :  { %2955 = vmatprep.subr.bf16.mxu1 %v3734_v19 }
0x15a0   :  { %2957 = vmatpush1.bf16.msra.mxu1 %v3738_v25 }
0x15a1   :  { %2959 = vmatprep.subr.bf16.mxu1 %v3742_v28 }
0x15a4   :  { %2961 = vmatpush1.bf16.msra.mxu1 %v3745_v30 }
0x15a5   :  { %2979 = vmatprep.subr.bf16.mxu1 %v3721_v58 }
0x166a   :  { %v1889_v21 = vpop.f32.mrb[12].mxu1 }
0x166b   :  { %v1891_v23 = vpop.f32.mrb[13].mxu1 }
0x166c   :  { %v1896_v24 = vcombine.low %v1889_v21, %v1891_v23  ;;  %v2093_v23 = vld [vmem:[#allocation4 + $0x5] ss:$8 sm:$0x3] }
0x166e   :  { %v1903_v26 = vrot.slane %v1896_v24, %v3783_v22 }
0x1670   :  { %v1910_v27 = vrot.slane %v1903_v26, %v3783_v22 }
0x1672   :  { %v1912_v57 = vadd.f32 %v1910_v27, %v1803_v5 }
0x1674   :  { %1923 = vrot.lane.b32.xlu0 %v1912_v57, %s3392_s3  ;;  %v2670_v31 = vmul.f32 -1.442695, %v1912_v57  ;;  %v1920_v34 = vrot.slane %v1912_v57, 1 }
0x1676   :  { %3157 = vpow2.f32 %v2670_v31 }
0x1677   :  { %3159 = vtanh.f32 %v1920_v34 }
0x1680   :  { %v3158_v35 = vpop.eup %3157 }
0x1681   :  { %v1916_v36 = vadd.f32 1.0, %v3158_v35  ;;  %v3160_v38 = vpop.eup %3159 }
0x1683   :  { %3161 = vrcp.f32 %v1916_v36 }
0x168d   :  { %v3162_v58 = vpop.eup %3161 }
0x168e   :  { %v1934_v41 = vmul.f32 %v3162_v58, %v3160_v38  ;;  %v1933_v42 = vmul.f32 %v3162_v58, %v1794_v3 }
0x1690   :  { %1936 = vrot.lane.b32.xlu1 %v1934_v41, %s3392_s3 }
0x16e6   :  { %v1924_v48 = vpop.permute.xlu0 %1923 }
0x16e7   :  { %v1925_v49 = vrot.slane %v1924_v48, 1 }
0x16e9   :  { %v2671_v45 = vmul.f32 -1.442695, %v1925_v49 }
0x1702   :  { %v1937_v43 = vpop.permute.xlu1 %1936 }
0x1703   :  { %v1939_v44 = vadd.f32 %v1937_v43, %v1933_v42 }
0x1705   :  { %3163 = vtanh.f32 %v1939_v44 }
0x1706   :  { %3165 = vpow2.f32 %v2671_v45 }
0x170f   :  { %v3164_v46 = vpop.eup %3163 }
0x1710   :  { %1942 = vrot.lane.b32.xlu1 %v3164_v46, %s3392_s3  ;;  %v3166_v52 = vpop.eup %3165 }
0x1711   :  { %v1930_v50 = vadd.f32 1.0, %v3166_v52  ;;  %v2238_v52 = vld [vmem:[#allocation4 + $0x6] ss:$8 sm:$0x3] }
0x1713   :  { %3167 = vrcp.f32 %v1930_v50 }
0x171d   :  { %v3168_v51 = vpop.eup %3167 }
0x1782   :  { %v1943_v53 = vpop.permute.xlu1 %1942 }
0x1783   :  { %v1945_v8 = vmul.f32 %v3168_v51, %v1943_v53 }
0x1785   :  { %1946 = vst.msk [vmem:[#allocation5 + $0x3] sm:$0x1] %vm1510_vm3, %v1945_v8  ;;  %2672 = vmatmul.mubr.msk.f32.vlgmr.msra.gmra.mrb[14].mxu0 %vm225_vm2, %v1945_v8 }
0x1786   :  { %2965 = vmatpush1.bf16.msra.mxu0 %v3723_v63  ;;  %2322 = vmatprep.mubr.f32.mxu0 %v3391_v0 }
0x1787   :  { %2967 = vmatprep.subr.bf16.mxu0 %v3726_v7 }
0x178a   :  { %2969 = vmatpush1.bf16.msra.mxu0 %v3731_v12 }
0x178b   :  { %2971 = vmatprep.subr.bf16.mxu0 %v3734_v19 }
0x178e   :  { %2973 = vmatpush1.bf16.msra.mxu0 %v3738_v25 }
0x178f   :  { %2975 = vmatprep.subr.bf16.mxu0 %v3742_v28 }
0x1792   :  { %2977 = vmatpush1.bf16.msra.mxu0 %v3745_v30 }
0x1858   :  { %v2034_v54 = vpop.f32.mrb[14].mxu0 }
0x1859   :  { %v2036_v9 = vpop.f32.mrb[15].mxu0 }
0x185a   :  { %v2041_v17 = vcombine.low %v2034_v54, %v2036_v9 }
0x185c   :  { %v2048_v29 = vrot.slane %v2041_v17, %v3783_v22 }
0x185e   :  { %v2055_v55 = vrot.slane %v2048_v29, %v3783_v22 }
0x1860   :  { %v2057_v18 = vadd.f32 %v2055_v55, %v1948_v32 }
0x1862   :  { %2068 = vrot.lane.b32.xlu1 %v2057_v18, %s3392_s3  ;;  %v2673_v33 = vmul.f32 -1.442695, %v2057_v18  ;;  %v2065_v37 = vrot.slane %v2057_v18, 1 }
0x1864   :  { %3169 = vpow2.f32 %v2673_v33 }
0x1865   :  { %3171 = vtanh.f32 %v2065_v37 }
0x186e   :  { %v3170_v56 = vpop.eup %3169 }
0x186f   :  { %v2061_v59 = vadd.f32 1.0, %v3170_v56  ;;  %v3172_v60 = vpop.eup %3171 }
0x1871   :  { %3173 = vrcp.f32 %v2061_v59 }
0x187b   :  { %v3174_v40 = vpop.eup %3173 }
0x187c   :  { %v2079_v47 = vmul.f32 %v3174_v40, %v3172_v60  ;;  %v2078_v61 = vmul.f32 %v3174_v40, %v1939_v44 }
0x187e   :  { %2081 = vrot.lane.b32.xlu0 %v2079_v47, %s3392_s3 }
0x18d4   :  { %v2069_v2 = vpop.permute.xlu1 %2068 }
0x18d5   :  { %v2070_v3 = vrot.slane %v2069_v2, 1 }
0x18d7   :  { %v2674_v6 = vmul.f32 -1.442695, %v2070_v3 }
0x18f0   :  { %v2082_v39 = vpop.permute.xlu0 %2081 }
0x18f1   :  { %v2084_v62 = vadd.f32 %v2082_v39, %v2078_v61 }
0x18f3   :  { %3175 = vtanh.f32 %v2084_v62 }
0x18f4   :  { %3177 = vpow2.f32 %v2674_v6 }
0x18fd   :  { %v3176_v1 = vpop.eup %3175 }
0x18fe   :  { %2087 = vrot.lane.b32.xlu0 %v3176_v1, %s3392_s3  ;;  %v3178_v10 = vpop.eup %3177 }
0x18ff   :  { %v2075_v4 = vadd.f32 1.0, %v3178_v10  ;;  %v2383_v10 = vld [vmem:[#allocation4 + $0x7] ss:$8 sm:$0x3] }
0x1901   :  { %3179 = vrcp.f32 %v2075_v4 }
0x190b   :  { %v3180_v11 = vpop.eup %3179 }
0x1970   :  { %v2088_v13 = vpop.permute.xlu0 %2087 }
0x1971   :  { %v2090_v14 = vmul.f32 %v3180_v11, %v2088_v13 }
0x1973   :  { %2091 = vst.msk [vmem:[#allocation5 + $0x4] sm:$0x1] %vm1510_vm3, %v2090_v14  ;;  %2675 = vmatmul.mubr.msk.f32.vlgmr.msra.gmra.mrb[14].mxu1 %vm225_vm2, %v2090_v14 }
0x1974   :  { %2981 = vmatpush1.bf16.msra.mxu1 %v3723_v63  ;;  %2467 = vmatprep.mubr.f32.mxu1 %v3391_v0 }
0x1975   :  { %2983 = vmatprep.subr.bf16.mxu1 %v3726_v7 }
0x1978   :  { %2985 = vmatpush1.bf16.msra.mxu1 %v3731_v12 }
0x1979   :  { %2987 = vmatprep.subr.bf16.mxu1 %v3734_v19 }
0x197c   :  { %2989 = vmatpush1.bf16.msra.mxu1 %v3738_v25 }
0x197d   :  { %2991 = vmatprep.subr.bf16.mxu1 %v3742_v28 }
0x1980   :  { %2993 = vmatpush1.bf16.msra.mxu1 %v3745_v30 }
0x1a46   :  { %v2179_v15 = vpop.f32.mrb[14].mxu1 }
0x1a47   :  { %v2181_v16 = vpop.f32.mrb[15].mxu1 }
0x1a48   :  { %v2186_v20 = vcombine.low %v2179_v15, %v2181_v16 }
0x1a4a   :  { %v2193_v21 = vrot.slane %v2186_v20, %v3783_v22 }
0x1a4c   :  { %v2200_v63 = vrot.slane %v2193_v21, %v3783_v22 }
0x1a4e   :  { %v2202_v24 = vadd.f32 %v2200_v63, %v2093_v23  ;;  %v2528_v63 = vld [vmem:[#allocation15] sm:$0xff]  ;;  %v2529_v23 = vld [vmem:[#allocation15 + $0x8] sm:$0xff] }
0x1a50   :  { %2213 = vrot.lane.b32.xlu0 %v2202_v24, %s3392_s3  ;;  %v2676_v7 = vmul.f32 -1.442695, %v2202_v24  ;;  %v2210_v12 = vrot.slane %v2202_v24, 1  ;;  %v2530_v24 = vld [vmem:[#allocation15 + $0x10] sm:$0xff] }
0x1a52   :  { %3181 = vpow2.f32 %v2676_v7  ;;  %v2995_v7 = vpack.c.bf16 %v2529_v23, %v2528_v63 }
0x1a53   :  { %3183 = vtanh.f32 %v2210_v12  ;;  %v2531_v12 = vld [vmem:[#allocation15 + $0x18] sm:$0xff] }
0x1a5c   :  { %v3182_v19 = vpop.eup %3181 }
0x1a5d   :  { %v2206_v25 = vadd.f32 1.0, %v3182_v19  ;;  %v3184_v28 = vpop.eup %3183  ;;  %v2998_v19 = vpack.c.bf16 %v2531_v12, %v2530_v24 }
0x1a5f   :  { %3185 = vrcp.f32 %v2206_v25 }
0x1a69   :  { %v3186_v30 = vpop.eup %3185 }
0x1a6a   :  { %v2224_v26 = vmul.f32 %v3186_v30, %v3184_v28  ;;  %v2223_v27 = vmul.f32 %v3186_v30, %v2084_v62 }
0x1a6c   :  { %2226 = vrot.lane.b32.xlu1 %v2224_v26, %s3392_s3  ;;  %v2532_v26 = vld [vmem:[#allocation15 + $0x20] sm:$0xff] }
0x1ac2   :  { %v2214_v34 = vpop.permute.xlu0 %2213 }
0x1ac3   :  { %v2215_v35 = vrot.slane %v2214_v34, 1 }
0x1ac5   :  { %v2677_v36 = vmul.f32 -1.442695, %v2215_v35 }
0x1ade   :  { %v2227_v5 = vpop.permute.xlu1 %2226 }
0x1adf   :  { %v2229_v57 = vadd.f32 %v2227_v5, %v2223_v27  ;;  %v2533_v27 = vld [vmem:[#allocation15 + $0x28] sm:$0xff]  ;;  %v2534_v5 = vld [vmem:[#allocation15 + $0x30] sm:$0xff] }
0x1ae1   :  { %3187 = vtanh.f32 %v2229_v57 }
0x1ae2   :  { %3189 = vpow2.f32 %v2677_v36 }
0x1aeb   :  { %v3188_v31 = vpop.eup %3187 }
0x1aec   :  { %2232 = vrot.lane.b32.xlu1 %v3188_v31, %s3392_s3  ;;  %v3190_v38 = vpop.eup %3189  ;;  %v2535_v31 = vld [vmem:[#allocation15 + $0x38] sm:$0xff] }
0x1aed   :  { %v2220_v58 = vadd.f32 1.0, %v3190_v38  ;;  %v3004_v34 = vpack.c.bf16 %v2535_v31, %v2534_v5 }
0x1aef   :  { %3191 = vrcp.f32 %v2220_v58 }
0x1af9   :  { %v3192_v41 = vpop.eup %3191 }
0x1b5e   :  { %v2233_v42 = vpop.permute.xlu1 %2232 }
0x1b5f   :  { %v2235_v43 = vmul.f32 %v3192_v41, %v2233_v42 }
0x1b61   :  { %2236 = vst.msk [vmem:[#allocation5 + $0x5] sm:$0x1] %vm1510_vm3, %v2235_v43  ;;  %2678 = vmatmul.mubr.msk.f32.vlgmr.msra.gmra.mrb[16].mxu0 %vm225_vm2, %v2235_v43 }
0x1b62   :  { %2711 = vmatprep.mubr.msk.f32.mxu0 %vm3396_vm4, %v3391_v0 }
0x1c34   :  { %v2324_v44 = vpop.f32.mrb[16].mxu0 }
0x1c35   :  { %v2326_v46 = vpop.f32.mrb[17].mxu0 }
0x1c36   :  { %v2331_v48 = vcombine.low %v2324_v44, %v2326_v46 }
0x1c38   :  { %v2338_v49 = vrot.slane %v2331_v48, %v3783_v22  ;;  %v2684_v48 = vld [vmem:[%s3908_s8] ss:$0 sm:$0xff] }
0x1c3a   :  { %v2345_v45 = vrot.slane %v2338_v49, %v3783_v22 }
0x1c3c   :  { %v2347_v50 = vadd.f32 %v2345_v45, %v2238_v52 }
0x1c3e   :  { %2358 = vrot.lane.b32.xlu1 %v2347_v50, %s3392_s3  ;;  %v2679_v51 = vmul.f32 -1.442695, %v2347_v50  ;;  %v2355_v53 = vrot.slane %v2347_v50, 1 }
0x1c40   :  { %3193 = vpow2.f32 %v2679_v51 }
0x1c41   :  { %3195 = vtanh.f32 %v2355_v53 }
0x1c4a   :  { %v3194_v8 = vpop.eup %3193 }
0x1c4b   :  { %v2351_v54 = vadd.f32 1.0, %v3194_v8  ;;  %v3196_v9 = vpop.eup %3195 }
0x1c4d   :  { %3197 = vrcp.f32 %v2351_v54 }
0x1c57   :  { %v3198_v17 = vpop.eup %3197 }
0x1c58   :  { %v2369_v29 = vmul.f32 %v3198_v17, %v3196_v9  ;;  %v2368_v55 = vmul.f32 %v3198_v17, %v2229_v57  ;;  %v3001_v57 = vpack.c.bf16 %v2533_v27, %v2532_v26 }
0x1c5a   :  { %2371 = vrot.lane.b32.xlu0 %v2369_v29, %s3392_s3 }
0x1cb0   :  { %v2359_v37 = vpop.permute.xlu1 %2358 }
0x1cb1   :  { %v2360_v56 = vrot.slane %v2359_v37, 1 }
0x1cb3   :  { %v2680_v59 = vmul.f32 -1.442695, %v2360_v56 }
0x1ccc   :  { %v2372_v32 = vpop.permute.xlu0 %2371 }
0x1ccd   :  { %v2374_v18 = vadd.f32 %v2372_v32, %v2368_v55 }
0x1ccf   :  { %3199 = vtanh.f32 %v2374_v18 }
0x1cd0   :  { %3201 = vpow2.f32 %v2680_v59 }
0x1cd9   :  { %v3200_v33 = vpop.eup %3199 }
0x1cda   :  { %2377 = vrot.lane.b32.xlu0 %v3200_v33, %s3392_s3  ;;  %v3202_v60 = vpop.eup %3201 }
0x1cdb   :  { %v2365_v40 = vadd.f32 1.0, %v3202_v60 }
0x1cdd   :  { %3203 = vrcp.f32 %v2365_v40 }
0x1ce7   :  { %v3204_v47 = vpop.eup %3203 }
0x1d4c   :  { %v2378_v61 = vpop.permute.xlu0 %2377 }
0x1d4d   :  { %v2380_v39 = vmul.f32 %v3204_v47, %v2378_v61 }
0x1d4f   :  { %2381 = vst.msk [vmem:[#allocation5 + $0x6] sm:$0x1] %vm1510_vm3, %v2380_v39  ;;  %2681 = vmatmul.mubr.msk.f32.vlgmr.msra.gmra.mrb[16].mxu1 %vm225_vm2, %v2380_v39 }
0x1e22   :  { %v2469_v62 = vpop.f32.mrb[16].mxu1 }
0x1e23   :  { %v2471_v1 = vpop.f32.mrb[17].mxu1 }
0x1e24   :  { %v2476_v2 = vcombine.low %v2469_v62, %v2471_v1 }
0x1e26   :  { %v2483_v3 = vrot.slane %v2476_v2, %v3783_v22 }
0x1e28   :  { %v2490_v6 = vrot.slane %v2483_v3, %v3783_v22  ;;  %v3395_v22 = vmov 0.0|0.0  }
0x1e29   :  { %2994 = vmatprep.subr.bf16.mxu0 %v3395_v22 }
0x1e2a   :  { %v2492_v4 = vadd.f32 %v2490_v6, %v2383_v10  ;;  %2996 = vmatpush3.bf16.msra.mxu0 %v2995_v7 }
0x1e2b   :  { %2997 = vmatprep.subr.bf16.mxu0 %v3395_v22 }
0x1e2c   :  { %2503 = vrot.lane.b32.xlu0 %v2492_v4, %s3392_s3  ;;  %v2682_v11 = vmul.f32 -1.442695, %v2492_v4  ;;  %v2500_v13 = vrot.slane %v2492_v4, 1 }
0x1e2e   :  { %3205 = vpow2.f32 %v2682_v11  ;;  %2999 = vmatpush3.bf16.msra.mxu0 %v2998_v19 }
0x1e2f   :  { %3207 = vtanh.f32 %v2500_v13  ;;  %3000 = vmatprep.subr.bf16.mxu0 %v3395_v22 }
0x1e32   :  { %3002 = vmatpush3.bf16.msra.mxu0 %v3001_v57 }
0x1e33   :  { %3003 = vmatprep.subr.bf16.mxu0 %v3395_v22 }
0x1e36   :  { %3005 = vmatpush3.bf16.msra.mxu0 %v3004_v34 }
0x1e38   :  { %v3206_v14 = vpop.eup %3205 }
0x1e39   :  { %v2496_v15 = vadd.f32 1.0, %v3206_v14  ;;  %v3208_v16 = vpop.eup %3207 }
0x1e3b   :  { %3209 = vrcp.f32 %v2496_v15 }
0x1e45   :  { %v3210_v20 = vpop.eup %3209 }
0x1e46   :  { %v2514_v21 = vmul.f32 %v3210_v20, %v3208_v16  ;;  %v2513_v25 = vmul.f32 %v3210_v20, %v2374_v18 }
0x1e48   :  { %2516 = vrot.lane.b32.xlu1 %v2514_v21, %s3392_s3 }
0x1e9e   :  { %v2504_v36 = vpop.permute.xlu0 %2503 }
0x1e9f   :  { %v2505_v38 = vrot.slane %v2504_v36, 1 }
0x1ea1   :  { %v2683_v58 = vmul.f32 -1.442695, %v2505_v38 }
0x1eba   :  { %v2517_v28 = vpop.permute.xlu1 %2516 }
0x1ebb   :  { %v2519_v30 = vadd.f32 %v2517_v28, %v2513_v25 }
0x1ebd   :  { %3211 = vtanh.f32 %v2519_v30 }
0x1ebe   :  { %3213 = vpow2.f32 %v2683_v58 }
0x1ec7   :  { %v3212_v35 = vpop.eup %3211 }
0x1ec8   :  { %2522 = vrot.lane.b32.xlu1 %v3212_v35, %s3392_s3  ;;  %v3214_v41 = vpop.eup %3213 }
0x1ec9   :  { %v2510_v42 = vadd.f32 1.0, %v3214_v41 }
0x1ecb   :  { %3215 = vrcp.f32 %v2510_v42 }
0x1ed5   :  { %v3216_v43 = vpop.eup %3215 }
0x1f3a   :  { %v2523_v44 = vpop.permute.xlu1 %2522 }
0x1f3b   :  { %v2525_v46 = vmul.f32 %v3216_v43, %v2523_v44 }
0x1f3d   :  { %2526 = vst.msk [vmem:[#allocation5 + $0x7] sm:$0x1] %vm1510_vm3, %v2525_v46 }
0x1f44   :  { %v2527_v0 = vld [vmem:[#allocation5] sm:$0xff] }
0x1f45   :  { %2712 = vmatmul.mubr.msk.f32.vlgmr.msra.gmra.mrb[18].mxu0 %vm225_vm2, %v2527_v0 }
0x2018   :  { %v2612_v49 = vpop.f32.mrb[18].mxu0 }
0x2019   :  { %v2613_v45 = vadd.f32 %v2684_v48, %v2612_v49  ;;  %v2713_v52 = vpop.f32.mrb[19].mxu0 }
0x201b   :  { %2616 = vst [vmem:[#allocation17] sm:$0xff] %v2613_v45 }
0x201c   :  { %3360 = shalt.err (!%p3357_p10)
}
0x201d   :  { %s3361_s2 = scalar_lea.hbm %s3909_s9, 128 }
0x201e   :  { %p3362_p11 = scmp.ne.s32.totalorder %s3909_s9, %s3361_s2  ;;  %p3365_p12 = scmp.lt.u32.totalorder %s3361_s2, %s3909_s9 }
0x2020   :  { %p3367_p13 = pnand %p3365_p12, %p3362_p11 }
0x2022   :  { %3370 = shalt.err (!%p3367_p13)
}
0x2023   :  { %2626 = dma.vmem_to_hbm [thread:$0]  %s2624_s25, 128, %s3909_s9, [#allocation8]  }
0x2024   :  { %3379 = dma.done.wait [#allocation8], 128  }
0x2025   :  { %3380 = vsyncadd [#allocation8], 4294967168 }
0x2026   :  { %2630 = vsyncpa [#allocation7], 1 }
0x2027   :  { %2631 = vsyncpa [#allocation10], 1 }
0x2028   :  { %2632 = vsyncpa [#allocation13], 1 }
0x2029   :  { %2633 = vsyncpa [#allocation16], 1 }
0x202a   :  { %2634 = vsyncpa [#allocation8], 1 }

</bundles_post_ra>
